<compile_context>
chip_gen: v6e
topology: v6e:2x2x1
jax: 0.10.0
libtpu: 0.0.40
codegen_flags: <defaults>
</compile_context>

<pallas_src>
import functools
import math

import jax
import jax.numpy as jnp
from jax.experimental import pallas as pl
from jax.experimental.pallas import tpu as pltpu


# ---------------------------------------------------------------------------
# Parameter packing (per Mixer, channels Ci -> Co, kernel size ks):
#   w123 : (3, Ci, ks*Ci)  conv1..conv3 weights, taps flattened into the
#                          contraction axis: w123[j, o, k*Ci + i]
#   w4   : (Co, ks*Ci)     conv4 weight, same flattening
#   aff  : (7, Ci, 1)      [bn1_scale, bn1_shift, bn2_scale, bn2_shift, b1, b2, b3]
#   b4   : (Co, 1)         conv4 bias
# ---------------------------------------------------------------------------


def _shift_matrices(bt, T, ks):
    """Block-diagonal banded shift matrices for a lane axis of bt folded
    batches of spatial length T.  (x @ S[k])[i, c] == x[i, c + (k - ks//2)]
    when the shifted position stays inside the same batch segment, else 0."""
    BT = bt * T
    p = ks // 2
    r = jnp.arange(BT)[:, None]          # source column
    c = jnp.arange(BT)[None, :]          # destination column
    t = c % T                            # spatial position within the batch
    mats = []
    for k in range(ks):
        d = k - p
        mats.append((r == c + d) & (t + d >= 0) & (t + d < T))
    return jnp.stack(mats, axis=0).astype(jnp.bfloat16)      # (ks, BT, BT)


def _mixer_body(x0, w123_ref, w4_ref, aff_ref, b4_ref, shift_ref, *, ks):
    """One Mixer block on a (Ci, bt*T) tile; returns conv4 output (Co, bt*T) f32."""
    relu = lambda v: jnp.maximum(v, jnp.float32(0.0))
    # MXU operands in bf16 (f32 accumulation); elementwise stays f32 (v5e-safe).
    w1 = w123_ref[0].astype(jnp.bfloat16)
    w2 = w123_ref[1].astype(jnp.bfloat16)
    w3 = w123_ref[2].astype(jnp.bfloat16)
    w4 = w4_ref[...].astype(jnp.bfloat16)
    shift = [shift_ref[k] for k in range(ks)]                 # ks x (BT, BT) bf16

    def conv(x, w, b):
        # One stacked-K matmul per conv.  The ks shifted taps are gathered by
        # the (exact 0/1) shift matrices on the MXU, so SAME padding and the
        # per-batch boundaries cost no VPU/XLU work.
        xb = x.astype(jnp.bfloat16)                                        # (Ci, BT)
        taps = [jnp.dot(xb, sk, preferred_element_type=jnp.float32)       # (Ci, BT)
                for sk in shift]
        stacked = jnp.concatenate(taps, axis=0).astype(jnp.bfloat16)      # (ks*Ci, BT)
        return jnp.dot(w, stacked, preferred_element_type=jnp.float32) + b

    x1 = aff_ref[0] * x0 + aff_ref[1]            # pre_norm (eval-mode BN)
    x1 = relu(conv(x1, w1, aff_ref[4]))          # conv1
    x1 = relu(conv(x1, w2, aff_ref[5]))          # conv2
    x1 = x1 + x0                                 # Mixer residual
    x2 = aff_ref[2] * x1 + aff_ref[3]            # middle_norm
    x2 = relu(conv(x2, w3, aff_ref[6]))          # conv3
    x2 = relu(conv(x2, w4, b4_ref[...]))         # conv4
    return x2


def encoder_kernel(x_ref,
                   tm_w123_ref, tm_w4_ref, tm_aff_ref, tm_b4_ref, tm_shift_ref,
                   ff_w123_ref, ff_w4_ref, ff_aff_ref, ff_b4_ref, ff_shift_ref,
                   out_ref, *, token_ks, ff_ks, predict_length):
    bt, L, H = x_ref.shape
    P = predict_length

    # ---- fold batch into lanes: token-mixer layout (channels=tokens, lanes=B*H)
    xt = jnp.concatenate([x_ref[b].astype(jnp.float32) for b in range(bt)],
                         axis=1)                                     # (L, bt*H)

    pred = _mixer_body(xt, tm_w123_ref, tm_w4_ref, tm_aff_ref, tm_b4_ref,
                       tm_shift_ref, ks=token_ks)                    # (P, bt*H)

    # ---- torch.cat((x[:, :-P, :], prediction), 1) + src   (still (L, bt*H))
    y = jnp.concatenate([xt[:L - P, :], pred], axis=0) + xt          # (L, bt*H)

    # ---- in-kernel permute (B,L,H)->(B,H,L): feed-forward layout (H, bt*L)
    z0 = jnp.concatenate([y[:, b * H:(b + 1) * H].T for b in range(bt)],
                         axis=1)                                     # (H, bt*L)

    ffo = _mixer_body(z0, ff_w123_ref, ff_w4_ref, ff_aff_ref, ff_b4_ref,
                      ff_shift_ref, ks=ff_ks)                        # (H, bt*L)
    out = ffo + z0                                                   # (H, bt*L)

    # ---- permute back to (bt, L, H) and store
    for b in range(bt):
        out_ref[b] = out[:, b * L:(b + 1) * L].T.astype(out_ref.dtype)


def encoder_layer_forward(x, tm, ff, *, predict_length, token_ks, ff_ks,
                          batch_tile=None):
    """x: (B, L, H) -> (B, L, H). Whole EncoderLayer in one pallas_call."""
    B, L, H = x.shape
    bt = B if batch_tile is None else batch_tile   # v7x: use bt=B//2 for 2 TCs
    assert B % bt == 0

    tm_shift = _shift_matrices(bt, H, token_ks)    # token mixer convs slide over H
    ff_shift = _shift_matrices(bt, L, ff_ks)       # feed-forward convs slide over L

    kernel = functools.partial(encoder_kernel, token_ks=token_ks, ff_ks=ff_ks,
                               predict_length=predict_length)

    def full(a):
        nd = a.ndim
        return pl.BlockSpec(a.shape, lambda i, nd=nd: (0,) * nd)

    params = [tm["w123"], tm["w4"], tm["aff"], tm["b4"], tm_shift,
              ff["w123"], ff["w4"], ff["aff"], ff["b4"], ff_shift]

    return pl.pallas_call(
        kernel,
        out_shape=jax.ShapeDtypeStruct((B, L, H), x.dtype),
        grid=(B // bt,),
        in_specs=[pl.BlockSpec((bt, L, H), lambda i: (i, 0, 0))]
                 + [full(p) for p in params],
        out_specs=pl.BlockSpec((bt, L, H), lambda i: (i, 0, 0)),
        compiler_params=pltpu.CompilerParams(
            dimension_semantics=("parallel",)),
    )(x, *params)


def init_mixer_params(key, in_dim, out_dim, ks):
    """Deterministic synthetic parameters matching nn.Conv1d / nn.BatchNorm1d."""
    kk = jax.random.split(key, 8)
    bound = 1.0 / math.sqrt(in_dim * ks)
    w123 = jax.random.uniform(kk[0], (3, in_dim, ks * in_dim), jnp.float32,
                              -bound, bound)
    w4 = jax.random.uniform(kk[1], (out_dim, ks * in_dim), jnp.float32,
                            -bound, bound)
    b123 = jax.random.uniform(kk[2], (3, in_dim, 1), jnp.float32, -bound, bound)
    b4 = jax.random.uniform(kk[3], (out_dim, 1), jnp.float32, -bound, bound)

    eps = 1e-5
    gamma1 = jax.random.uniform(kk[4], (in_dim, 1), jnp.float32, 0.5, 1.5)
    beta1 = jax.random.uniform(kk[5], (in_dim, 1), jnp.float32, -0.1, 0.1)
    gamma2 = jax.random.uniform(kk[6], (in_dim, 1), jnp.float32, 0.5, 1.5)
    beta2 = jax.random.uniform(kk[7], (in_dim, 1), jnp.float32, -0.1, 0.1)
    s1 = gamma1 / jnp.sqrt(1.0 + eps)   # eval-mode BN (mean=0, var=1)
    s2 = gamma2 / jnp.sqrt(1.0 + eps)
    aff = jnp.stack([s1, beta1, s2, beta2, b123[0], b123[1], b123[2]], axis=0)
    return dict(w123=w123, w4=w4, aff=aff, b4=b4)


# ----------------------------- pure-JAX reference ---------------------------


def _conv1d_ref(x, wflat, b, ks):
    """x: (B, Ci, T), wflat: (Co, ks*Ci) with [o, k*Ci+i], b: (Co, 1)."""
    B, Ci, T = x.shape
    Co = wflat.shape[0]
    p = ks // 2
    w = wflat.reshape(Co, ks, Ci)
    xp = jnp.pad(x, ((0, 0), (0, 0), (p, p)))
    out = jnp.zeros((B, Co, T), jnp.float32) + b
    for k in range(ks):
        xk = jax.lax.slice_in_dim(xp, k, k + T, axis=2)       # x[:, :, t+k-p]
        out = out + jnp.einsum("oi,bit->bot",
                               w[:, k, :].astype(jnp.bfloat16),
                               xk.astype(jnp.bfloat16),
                               preferred_element_type=jnp.float32)
    return out


def _mixer_ref(x, p, ks):
    relu = lambda v: jnp.maximum(v, 0.0)
    aff = p["aff"]
    x1 = aff[0] * x + aff[1]
    x1 = relu(_conv1d_ref(x1, p["w123"][0], aff[4], ks))
    x1 = relu(_conv1d_ref(x1, p["w123"][1], aff[5], ks))
    x1 = x1 + x
    x2 = aff[2] * x1 + aff[3]
    x2 = relu(_conv1d_ref(x2, p["w123"][2], aff[6], ks))
    x2 = relu(_conv1d_ref(x2, p["w4"], p["b4"], ks))
    return x2


def encoder_layer_ref(x, tm, ff, *, predict_length, token_ks, ff_ks):
    B, L, H = x.shape
    P = predict_length
    src = x
    pred = _mixer_ref(x, tm, token_ks)                          # (B, P, H)
    xcat = jnp.concatenate([x[:, :L - P, :], pred], axis=1)     # (B, L, H)
    z = jnp.transpose(xcat + src, (0, 2, 1))                    # (B, H, L)
    out = _mixer_ref(z, ff, ff_ks) + z                          # (B, H, L)
    return jnp.transpose(out, (0, 2, 1))                        # (B, L, H)


if __name__ == "__main__":
    B = 2
    hidden_dim = 32
    input_length = 16
    predict_length = 8
    token_mixer_ks = 3
    feed_forward_ks = 3

    key = jax.random.PRNGKey(0)
    kx, k_tm, k_ff = jax.random.split(key, 3)
    x = jax.random.normal(kx, (B, input_length, hidden_dim), jnp.float32)

    tm_params = init_mixer_params(k_tm, input_length, predict_length, token_mixer_ks)
    ff_params = init_mixer_params(k_ff, hidden_dim, hidden_dim, feed_forward_ks)

    fwd = jax.jit(functools.partial(
        encoder_layer_forward,
        predict_length=predict_length,
        token_ks=token_mixer_ks,
        ff_ks=feed_forward_ks))

    out = fwd(x, tm_params, ff_params)
    jax.block_until_ready(out)

    ref = encoder_layer_ref(x, tm_params, ff_params,
                            predict_length=predict_length,
                            token_ks=token_mixer_ks,
                            ff_ks=feed_forward_ks)

    assert out.shape == (B, input_length, hidden_dim)
    assert jnp.all(jnp.isfinite(out))
    max_err = float(jnp.max(jnp.abs(out - ref)))
    assert max_err < 1e-2, f"kernel mismatch vs reference: max_err={max_err}"
    print("KERNEL_OK")
</pallas_src>

<mosaic_0001>
module attributes {stable_mosaic.version = 11 : i64} {
  func.func @encoder_kernel(%arg0: i32, %arg1: memref<2x16x32xf32, #tpu.memory_space<vmem>>, %arg2: memref<3x16x48xf32, #tpu.memory_space<vmem>>, %arg3: memref<8x48xf32, #tpu.memory_space<vmem>>, %arg4: memref<7x16x1xf32, #tpu.memory_space<vmem>>, %arg5: memref<8x1xf32, #tpu.memory_space<vmem>>, %arg6: memref<3x64x64xbf16, #tpu.memory_space<vmem>>, %arg7: memref<3x32x96xf32, #tpu.memory_space<vmem>>, %arg8: memref<32x96xf32, #tpu.memory_space<vmem>>, %arg9: memref<7x32x1xf32, #tpu.memory_space<vmem>>, %arg10: memref<32x1xf32, #tpu.memory_space<vmem>>, %arg11: memref<3x32x32xbf16, #tpu.memory_space<vmem>>, %arg12: memref<2x16x32xf32, #tpu.memory_space<vmem>>) attributes {dimension_semantics = [#tpu.dimension_semantics<parallel>], iteration_bounds = array<i64: 1>, scalar_prefetch = 0 : i64, scratch_operands = 0 : i64, tpu.core_type = #tpu.core_type<tc>, window_params = [{transform_indices = @transform_0, window_bounds = array<i64: 2, 16, 32>}, {pipeline_mode = #tpu.pipeline_mode<synchronous>, transform_indices = @transform_1, window_bounds = array<i64: 3, 16, 48>}, {pipeline_mode = #tpu.pipeline_mode<synchronous>, transform_indices = @transform_2, window_bounds = array<i64: 8, 48>}, {pipeline_mode = #tpu.pipeline_mode<synchronous>, transform_indices = @transform_3, window_bounds = array<i64: 7, 16, 1>}, {pipeline_mode = #tpu.pipeline_mode<synchronous>, transform_indices = @transform_4, window_bounds = array<i64: 8, 1>}, {pipeline_mode = #tpu.pipeline_mode<synchronous>, transform_indices = @transform_5, window_bounds = array<i64: 3, 64, 64>}, {pipeline_mode = #tpu.pipeline_mode<synchronous>, transform_indices = @transform_6, window_bounds = array<i64: 3, 32, 96>}, {pipeline_mode = #tpu.pipeline_mode<synchronous>, transform_indices = @transform_7, window_bounds = array<i64: 32, 96>}, {pipeline_mode = #tpu.pipeline_mode<synchronous>, transform_indices = @transform_8, window_bounds = array<i64: 7, 32, 1>}, {pipeline_mode = #tpu.pipeline_mode<synchronous>, transform_indices = @transform_9, window_bounds = array<i64: 32, 1>}, {pipeline_mode = #tpu.pipeline_mode<synchronous>, transform_indices = @transform_10, window_bounds = array<i64: 3, 32, 32>}, {transform_indices = @transform_11, window_bounds = array<i64: 2, 16, 32>}]} {
    %c0 = arith.constant 0 : index
    %c0_0 = arith.constant 0 : index
    %c0_1 = arith.constant 0 : index
    %0 = vector.load %arg1[%c0, %c0_0, %c0_1] : memref<2x16x32xf32, #tpu.memory_space<vmem>>, vector<1x16x32xf32>
    %1 = vector.shape_cast %0 : vector<1x16x32xf32> to vector<16x32xf32>
    %c1 = arith.constant 1 : index
    %c0_2 = arith.constant 0 : index
    %c0_3 = arith.constant 0 : index
    %2 = vector.load %arg1[%c1, %c0_2, %c0_3] : memref<2x16x32xf32, #tpu.memory_space<vmem>>, vector<1x16x32xf32>
    %3 = vector.shape_cast %2 : vector<1x16x32xf32> to vector<16x32xf32>
    %4 = tpu.concatenate %1, %3 in 1 : vector<16x32xf32>, vector<16x32xf32> -> vector<16x64xf32>
    %c0_4 = arith.constant 0 : index
    %c0_5 = arith.constant 0 : index
    %c0_6 = arith.constant 0 : index
    %5 = vector.load %arg2[%c0_4, %c0_5, %c0_6] : memref<3x16x48xf32, #tpu.memory_space<vmem>>, vector<1x16x48xf32>
    %6 = vector.shape_cast %5 : vector<1x16x48xf32> to vector<16x48xf32>
    %7 = arith.truncf %6 : vector<16x48xf32> to vector<16x48xbf16>
    %c1_7 = arith.constant 1 : index
    %c0_8 = arith.constant 0 : index
    %c0_9 = arith.constant 0 : index
    %8 = vector.load %arg2[%c1_7, %c0_8, %c0_9] : memref<3x16x48xf32, #tpu.memory_space<vmem>>, vector<1x16x48xf32>
    %9 = vector.shape_cast %8 : vector<1x16x48xf32> to vector<16x48xf32>
    %10 = arith.truncf %9 : vector<16x48xf32> to vector<16x48xbf16>
    %c2 = arith.constant 2 : index
    %c0_10 = arith.constant 0 : index
    %c0_11 = arith.constant 0 : index
    %11 = vector.load %arg2[%c2, %c0_10, %c0_11] : memref<3x16x48xf32, #tpu.memory_space<vmem>>, vector<1x16x48xf32>
    %12 = vector.shape_cast %11 : vector<1x16x48xf32> to vector<16x48xf32>
    %13 = arith.truncf %12 : vector<16x48xf32> to vector<16x48xbf16>
    %c0_12 = arith.constant 0 : index
    %c0_13 = arith.constant 0 : index
    %14 = vector.load %arg3[%c0_12, %c0_13] : memref<8x48xf32, #tpu.memory_space<vmem>>, vector<8x48xf32>
    %15 = arith.truncf %14 : vector<8x48xf32> to vector<8x48xbf16>
    %c0_14 = arith.constant 0 : index
    %c0_15 = arith.constant 0 : index
    %c0_16 = arith.constant 0 : index
    %16 = vector.load %arg6[%c0_14, %c0_15, %c0_16] : memref<3x64x64xbf16, #tpu.memory_space<vmem>>, vector<1x64x64xbf16>
    %17 = vector.shape_cast %16 : vector<1x64x64xbf16> to vector<64x64xbf16>
    %c1_17 = arith.constant 1 : index
    %c0_18 = arith.constant 0 : index
    %c0_19 = arith.constant 0 : index
    %18 = vector.load %arg6[%c1_17, %c0_18, %c0_19] : memref<3x64x64xbf16, #tpu.memory_space<vmem>>, vector<1x64x64xbf16>
    %19 = vector.shape_cast %18 : vector<1x64x64xbf16> to vector<64x64xbf16>
    %c2_20 = arith.constant 2 : index
    %c0_21 = arith.constant 0 : index
    %c0_22 = arith.constant 0 : index
    %20 = vector.load %arg6[%c2_20, %c0_21, %c0_22] : memref<3x64x64xbf16, #tpu.memory_space<vmem>>, vector<1x64x64xbf16>
    %21 = vector.shape_cast %20 : vector<1x64x64xbf16> to vector<64x64xbf16>
    %c0_23 = arith.constant 0 : index
    %c0_24 = arith.constant 0 : index
    %c0_25 = arith.constant 0 : index
    %22 = vector.load %arg4[%c0_23, %c0_24, %c0_25] : memref<7x16x1xf32, #tpu.memory_space<vmem>>, vector<1x16x1xf32>
    %23 = vector.shape_cast %22 : vector<1x16x1xf32> to vector<16x1xf32>
    %24 = vector.broadcast %23 : vector<16x1xf32> to vector<16x64xf32>
    %25 = arith.mulf %24, %4 : vector<16x64xf32>
    %c1_26 = arith.constant 1 : index
    %c0_27 = arith.constant 0 : index
    %c0_28 = arith.constant 0 : index
    %26 = vector.load %arg4[%c1_26, %c0_27, %c0_28] : memref<7x16x1xf32, #tpu.memory_space<vmem>>, vector<1x16x1xf32>
    %27 = vector.shape_cast %26 : vector<1x16x1xf32> to vector<16x1xf32>
    %28 = vector.broadcast %27 : vector<16x1xf32> to vector<16x64xf32>
    %29 = arith.addf %25, %28 : vector<16x64xf32>
    %c4 = arith.constant 4 : index
    %c0_29 = arith.constant 0 : index
    %c0_30 = arith.constant 0 : index
    %30 = vector.load %arg4[%c4, %c0_29, %c0_30] : memref<7x16x1xf32, #tpu.memory_space<vmem>>, vector<1x16x1xf32>
    %31 = vector.shape_cast %30 : vector<1x16x1xf32> to vector<16x1xf32>
    %32 = arith.truncf %29 : vector<16x64xf32> to vector<16x64xbf16>
    %cst = arith.constant dense<0.000000e+00> : vector<16x64xf32>
    %33 = tpu.matmul %32, %17, %cst {dimension_numbers = #tpu.dot_dimension_numbers<[1], [0], [0], [1], [0, 0, 1, 1], [], []>} : vector<16x64xbf16>, vector<64x64xbf16>, vector<16x64xf32> -> vector<16x64xf32>
    %cst_31 = arith.constant dense<0.000000e+00> : vector<16x64xf32>
    %34 = tpu.matmul %32, %19, %cst_31 {dimension_numbers = #tpu.dot_dimension_numbers<[1], [0], [0], [1], [0, 0, 1, 1], [], []>} : vector<16x64xbf16>, vector<64x64xbf16>, vector<16x64xf32> -> vector<16x64xf32>
    %cst_32 = arith.constant dense<0.000000e+00> : vector<16x64xf32>
    %35 = tpu.matmul %32, %21, %cst_32 {dimension_numbers = #tpu.dot_dimension_numbers<[1], [0], [0], [1], [0, 0, 1, 1], [], []>} : vector<16x64xbf16>, vector<64x64xbf16>, vector<16x64xf32> -> vector<16x64xf32>
    %36 = tpu.concatenate %33, %34, %35 in 0 : vector<16x64xf32>, vector<16x64xf32>, vector<16x64xf32> -> vector<48x64xf32>
    %37 = arith.truncf %36 : vector<48x64xf32> to vector<48x64xbf16>
    %cst_33 = arith.constant dense<0.000000e+00> : vector<16x64xf32>
    %38 = tpu.matmul %7, %37, %cst_33 {dimension_numbers = #tpu.dot_dimension_numbers<[1], [0], [0], [1], [0, 0, 1, 1], [], []>} : vector<16x48xbf16>, vector<48x64xbf16>, vector<16x64xf32> -> vector<16x64xf32>
    %39 = vector.broadcast %31 : vector<16x1xf32> to vector<16x64xf32>
    %40 = arith.addf %38, %39 : vector<16x64xf32>
    %cst_34 = arith.constant 0.000000e+00 : f32
    %41 = vector.broadcast %cst_34 : f32 to vector<16x64xf32>
    %42 = arith.maximumf %40, %41 : vector<16x64xf32>
    %c5 = arith.constant 5 : index
    %c0_35 = arith.constant 0 : index
    %c0_36 = arith.constant 0 : index
    %43 = vector.load %arg4[%c5, %c0_35, %c0_36] : memref<7x16x1xf32, #tpu.memory_space<vmem>>, vector<1x16x1xf32>
    %44 = vector.shape_cast %43 : vector<1x16x1xf32> to vector<16x1xf32>
    %45 = arith.truncf %42 : vector<16x64xf32> to vector<16x64xbf16>
    %cst_37 = arith.constant dense<0.000000e+00> : vector<16x64xf32>
    %46 = tpu.matmul %45, %17, %cst_37 {dimension_numbers = #tpu.dot_dimension_numbers<[1], [0], [0], [1], [0, 0, 1, 1], [], []>} : vector<16x64xbf16>, vector<64x64xbf16>, vector<16x64xf32> -> vector<16x64xf32>
    %cst_38 = arith.constant dense<0.000000e+00> : vector<16x64xf32>
    %47 = tpu.matmul %45, %19, %cst_38 {dimension_numbers = #tpu.dot_dimension_numbers<[1], [0], [0], [1], [0, 0, 1, 1], [], []>} : vector<16x64xbf16>, vector<64x64xbf16>, vector<16x64xf32> -> vector<16x64xf32>
    %cst_39 = arith.constant dense<0.000000e+00> : vector<16x64xf32>
    %48 = tpu.matmul %45, %21, %cst_39 {dimension_numbers = #tpu.dot_dimension_numbers<[1], [0], [0], [1], [0, 0, 1, 1], [], []>} : vector<16x64xbf16>, vector<64x64xbf16>, vector<16x64xf32> -> vector<16x64xf32>
    %49 = tpu.concatenate %46, %47, %48 in 0 : vector<16x64xf32>, vector<16x64xf32>, vector<16x64xf32> -> vector<48x64xf32>
    %50 = arith.truncf %49 : vector<48x64xf32> to vector<48x64xbf16>
    %cst_40 = arith.constant dense<0.000000e+00> : vector<16x64xf32>
    %51 = tpu.matmul %10, %50, %cst_40 {dimension_numbers = #tpu.dot_dimension_numbers<[1], [0], [0], [1], [0, 0, 1, 1], [], []>} : vector<16x48xbf16>, vector<48x64xbf16>, vector<16x64xf32> -> vector<16x64xf32>
    %52 = vector.broadcast %44 : vector<16x1xf32> to vector<16x64xf32>
    %53 = arith.addf %51, %52 : vector<16x64xf32>
    %cst_41 = arith.constant 0.000000e+00 : f32
    %54 = vector.broadcast %cst_41 : f32 to vector<16x64xf32>
    %55 = arith.maximumf %53, %54 : vector<16x64xf32>
    %56 = arith.addf %55, %4 : vector<16x64xf32>
    %c2_42 = arith.constant 2 : index
    %c0_43 = arith.constant 0 : index
    %c0_44 = arith.constant 0 : index
    %57 = vector.load %arg4[%c2_42, %c0_43, %c0_44] : memref<7x16x1xf32, #tpu.memory_space<vmem>>, vector<1x16x1xf32>
    %58 = vector.shape_cast %57 : vector<1x16x1xf32> to vector<16x1xf32>
    %59 = vector.broadcast %58 : vector<16x1xf32> to vector<16x64xf32>
    %60 = arith.mulf %59, %56 : vector<16x64xf32>
    %c3 = arith.constant 3 : index
    %c0_45 = arith.constant 0 : index
    %c0_46 = arith.constant 0 : index
    %61 = vector.load %arg4[%c3, %c0_45, %c0_46] : memref<7x16x1xf32, #tpu.memory_space<vmem>>, vector<1x16x1xf32>
    %62 = vector.shape_cast %61 : vector<1x16x1xf32> to vector<16x1xf32>
    %63 = vector.broadcast %62 : vector<16x1xf32> to vector<16x64xf32>
    %64 = arith.addf %60, %63 : vector<16x64xf32>
    %c6 = arith.constant 6 : index
    %c0_47 = arith.constant 0 : index
    %c0_48 = arith.constant 0 : index
    %65 = vector.load %arg4[%c6, %c0_47, %c0_48] : memref<7x16x1xf32, #tpu.memory_space<vmem>>, vector<1x16x1xf32>
    %66 = vector.shape_cast %65 : vector<1x16x1xf32> to vector<16x1xf32>
    %67 = arith.truncf %64 : vector<16x64xf32> to vector<16x64xbf16>
    %cst_49 = arith.constant dense<0.000000e+00> : vector<16x64xf32>
    %68 = tpu.matmul %67, %17, %cst_49 {dimension_numbers = #tpu.dot_dimension_numbers<[1], [0], [0], [1], [0, 0, 1, 1], [], []>} : vector<16x64xbf16>, vector<64x64xbf16>, vector<16x64xf32> -> vector<16x64xf32>
    %cst_50 = arith.constant dense<0.000000e+00> : vector<16x64xf32>
    %69 = tpu.matmul %67, %19, %cst_50 {dimension_numbers = #tpu.dot_dimension_numbers<[1], [0], [0], [1], [0, 0, 1, 1], [], []>} : vector<16x64xbf16>, vector<64x64xbf16>, vector<16x64xf32> -> vector<16x64xf32>
    %cst_51 = arith.constant dense<0.000000e+00> : vector<16x64xf32>
    %70 = tpu.matmul %67, %21, %cst_51 {dimension_numbers = #tpu.dot_dimension_numbers<[1], [0], [0], [1], [0, 0, 1, 1], [], []>} : vector<16x64xbf16>, vector<64x64xbf16>, vector<16x64xf32> -> vector<16x64xf32>
    %71 = tpu.concatenate %68, %69, %70 in 0 : vector<16x64xf32>, vector<16x64xf32>, vector<16x64xf32> -> vector<48x64xf32>
    %72 = arith.truncf %71 : vector<48x64xf32> to vector<48x64xbf16>
    %cst_52 = arith.constant dense<0.000000e+00> : vector<16x64xf32>
    %73 = tpu.matmul %13, %72, %cst_52 {dimension_numbers = #tpu.dot_dimension_numbers<[1], [0], [0], [1], [0, 0, 1, 1], [], []>} : vector<16x48xbf16>, vector<48x64xbf16>, vector<16x64xf32> -> vector<16x64xf32>
    %74 = vector.broadcast %66 : vector<16x1xf32> to vector<16x64xf32>
    %75 = arith.addf %73, %74 : vector<16x64xf32>
    %cst_53 = arith.constant 0.000000e+00 : f32
    %76 = vector.broadcast %cst_53 : f32 to vector<16x64xf32>
    %77 = arith.maximumf %75, %76 : vector<16x64xf32>
    %c0_54 = arith.constant 0 : index
    %c0_55 = arith.constant 0 : index
    %78 = vector.load %arg5[%c0_54, %c0_55] : memref<8x1xf32, #tpu.memory_space<vmem>>, vector<8x1xf32>
    %79 = arith.truncf %77 : vector<16x64xf32> to vector<16x64xbf16>
    %cst_56 = arith.constant dense<0.000000e+00> : vector<16x64xf32>
    %80 = tpu.matmul %79, %17, %cst_56 {dimension_numbers = #tpu.dot_dimension_numbers<[1], [0], [0], [1], [0, 0, 1, 1], [], []>} : vector<16x64xbf16>, vector<64x64xbf16>, vector<16x64xf32> -> vector<16x64xf32>
    %cst_57 = arith.constant dense<0.000000e+00> : vector<16x64xf32>
    %81 = tpu.matmul %79, %19, %cst_57 {dimension_numbers = #tpu.dot_dimension_numbers<[1], [0], [0], [1], [0, 0, 1, 1], [], []>} : vector<16x64xbf16>, vector<64x64xbf16>, vector<16x64xf32> -> vector<16x64xf32>
    %cst_58 = arith.constant dense<0.000000e+00> : vector<16x64xf32>
    %82 = tpu.matmul %79, %21, %cst_58 {dimension_numbers = #tpu.dot_dimension_numbers<[1], [0], [0], [1], [0, 0, 1, 1], [], []>} : vector<16x64xbf16>, vector<64x64xbf16>, vector<16x64xf32> -> vector<16x64xf32>
    %83 = tpu.concatenate %80, %81, %82 in 0 : vector<16x64xf32>, vector<16x64xf32>, vector<16x64xf32> -> vector<48x64xf32>
    %84 = arith.truncf %83 : vector<48x64xf32> to vector<48x64xbf16>
    %cst_59 = arith.constant dense<0.000000e+00> : vector<8x64xf32>
    %85 = tpu.matmul %15, %84, %cst_59 {dimension_numbers = #tpu.dot_dimension_numbers<[1], [0], [0], [1], [0, 0, 1, 1], [], []>} : vector<8x48xbf16>, vector<48x64xbf16>, vector<8x64xf32> -> vector<8x64xf32>
    %86 = vector.broadcast %78 : vector<8x1xf32> to vector<8x64xf32>
    %87 = arith.addf %85, %86 : vector<8x64xf32>
    %cst_60 = arith.constant 0.000000e+00 : f32
    %88 = vector.broadcast %cst_60 : f32 to vector<8x64xf32>
    %89 = arith.maximumf %87, %88 : vector<8x64xf32>
    %90 = vector.extract_strided_slice %4 {offsets = [0, 0], sizes = [8, 64], strides = [1, 1]} : vector<16x64xf32> to vector<8x64xf32>
    %91 = tpu.concatenate %90, %89 in 0 : vector<8x64xf32>, vector<8x64xf32> -> vector<16x64xf32>
    %92 = arith.addf %91, %4 : vector<16x64xf32>
    %93 = vector.extract_strided_slice %92 {offsets = [0, 0], sizes = [16, 32], strides = [1, 1]} : vector<16x64xf32> to vector<16x32xf32>
    %94 = tpu.transpose %93, [1, 0] : vector<16x32xf32> -> vector<32x16xf32>
    %95 = vector.extract_strided_slice %92 {offsets = [0, 32], sizes = [16, 32], strides = [1, 1]} : vector<16x64xf32> to vector<16x32xf32>
    %96 = tpu.transpose %95, [1, 0] : vector<16x32xf32> -> vector<32x16xf32>
    %97 = tpu.concatenate %94, %96 in 1 : vector<32x16xf32>, vector<32x16xf32> -> vector<32x32xf32>
    %c0_61 = arith.constant 0 : index
    %c0_62 = arith.constant 0 : index
    %c0_63 = arith.constant 0 : index
    %98 = vector.load %arg7[%c0_61, %c0_62, %c0_63] : memref<3x32x96xf32, #tpu.memory_space<vmem>>, vector<1x32x96xf32>
    %99 = vector.shape_cast %98 : vector<1x32x96xf32> to vector<32x96xf32>
    %100 = arith.truncf %99 : vector<32x96xf32> to vector<32x96xbf16>
    %c1_64 = arith.constant 1 : index
    %c0_65 = arith.constant 0 : index
    %c0_66 = arith.constant 0 : index
    %101 = vector.load %arg7[%c1_64, %c0_65, %c0_66] : memref<3x32x96xf32, #tpu.memory_space<vmem>>, vector<1x32x96xf32>
    %102 = vector.shape_cast %101 : vector<1x32x96xf32> to vector<32x96xf32>
    %103 = arith.truncf %102 : vector<32x96xf32> to vector<32x96xbf16>
    %c2_67 = arith.constant 2 : index
    %c0_68 = arith.constant 0 : index
    %c0_69 = arith.constant 0 : index
    %104 = vector.load %arg7[%c2_67, %c0_68, %c0_69] : memref<3x32x96xf32, #tpu.memory_space<vmem>>, vector<1x32x96xf32>
    %105 = vector.shape_cast %104 : vector<1x32x96xf32> to vector<32x96xf32>
    %106 = arith.truncf %105 : vector<32x96xf32> to vector<32x96xbf16>
    %c0_70 = arith.constant 0 : index
    %c0_71 = arith.constant 0 : index
    %107 = vector.load %arg8[%c0_70, %c0_71] : memref<32x96xf32, #tpu.memory_space<vmem>>, vector<32x96xf32>
    %108 = arith.truncf %107 : vector<32x96xf32> to vector<32x96xbf16>
    %c0_72 = arith.constant 0 : index
    %c0_73 = arith.constant 0 : index
    %c0_74 = arith.constant 0 : index
    %109 = vector.load %arg11[%c0_72, %c0_73, %c0_74] : memref<3x32x32xbf16, #tpu.memory_space<vmem>>, vector<1x32x32xbf16>
    %110 = vector.shape_cast %109 : vector<1x32x32xbf16> to vector<32x32xbf16>
    %c1_75 = arith.constant 1 : index
    %c0_76 = arith.constant 0 : index
    %c0_77 = arith.constant 0 : index
    %111 = vector.load %arg11[%c1_75, %c0_76, %c0_77] : memref<3x32x32xbf16, #tpu.memory_space<vmem>>, vector<1x32x32xbf16>
    %112 = vector.shape_cast %111 : vector<1x32x32xbf16> to vector<32x32xbf16>
    %c2_78 = arith.constant 2 : index
    %c0_79 = arith.constant 0 : index
    %c0_80 = arith.constant 0 : index
    %113 = vector.load %arg11[%c2_78, %c0_79, %c0_80] : memref<3x32x32xbf16, #tpu.memory_space<vmem>>, vector<1x32x32xbf16>
    %114 = vector.shape_cast %113 : vector<1x32x32xbf16> to vector<32x32xbf16>
    %c0_81 = arith.constant 0 : index
    %c0_82 = arith.constant 0 : index
    %c0_83 = arith.constant 0 : index
    %115 = vector.load %arg9[%c0_81, %c0_82, %c0_83] : memref<7x32x1xf32, #tpu.memory_space<vmem>>, vector<1x32x1xf32>
    %116 = vector.shape_cast %115 : vector<1x32x1xf32> to vector<32x1xf32>
    %117 = vector.broadcast %116 : vector<32x1xf32> to vector<32x32xf32>
    %118 = arith.mulf %117, %97 : vector<32x32xf32>
    %c1_84 = arith.constant 1 : index
    %c0_85 = arith.constant 0 : index
    %c0_86 = arith.constant 0 : index
    %119 = vector.load %arg9[%c1_84, %c0_85, %c0_86] : memref<7x32x1xf32, #tpu.memory_space<vmem>>, vector<1x32x1xf32>
    %120 = vector.shape_cast %119 : vector<1x32x1xf32> to vector<32x1xf32>
    %121 = vector.broadcast %120 : vector<32x1xf32> to vector<32x32xf32>
    %122 = arith.addf %118, %121 : vector<32x32xf32>
    %c4_87 = arith.constant 4 : index
    %c0_88 = arith.constant 0 : index
    %c0_89 = arith.constant 0 : index
    %123 = vector.load %arg9[%c4_87, %c0_88, %c0_89] : memref<7x32x1xf32, #tpu.memory_space<vmem>>, vector<1x32x1xf32>
    %124 = vector.shape_cast %123 : vector<1x32x1xf32> to vector<32x1xf32>
    %125 = arith.truncf %122 : vector<32x32xf32> to vector<32x32xbf16>
    %cst_90 = arith.constant dense<0.000000e+00> : vector<32x32xf32>
    %126 = tpu.matmul %125, %110, %cst_90 {dimension_numbers = #tpu.dot_dimension_numbers<[1], [0], [0], [1], [0, 0, 1, 1], [], []>} : vector<32x32xbf16>, vector<32x32xbf16>, vector<32x32xf32> -> vector<32x32xf32>
    %cst_91 = arith.constant dense<0.000000e+00> : vector<32x32xf32>
    %127 = tpu.matmul %125, %112, %cst_91 {dimension_numbers = #tpu.dot_dimension_numbers<[1], [0], [0], [1], [0, 0, 1, 1], [], []>} : vector<32x32xbf16>, vector<32x32xbf16>, vector<32x32xf32> -> vector<32x32xf32>
    %cst_92 = arith.constant dense<0.000000e+00> : vector<32x32xf32>
    %128 = tpu.matmul %125, %114, %cst_92 {dimension_numbers = #tpu.dot_dimension_numbers<[1], [0], [0], [1], [0, 0, 1, 1], [], []>} : vector<32x32xbf16>, vector<32x32xbf16>, vector<32x32xf32> -> vector<32x32xf32>
    %129 = tpu.concatenate %126, %127, %128 in 0 : vector<32x32xf32>, vector<32x32xf32>, vector<32x32xf32> -> vector<96x32xf32>
    %130 = arith.truncf %129 : vector<96x32xf32> to vector<96x32xbf16>
    %cst_93 = arith.constant dense<0.000000e+00> : vector<32x32xf32>
    %131 = tpu.matmul %100, %130, %cst_93 {dimension_numbers = #tpu.dot_dimension_numbers<[1], [0], [0], [1], [0, 0, 1, 1], [], []>} : vector<32x96xbf16>, vector<96x32xbf16>, vector<32x32xf32> -> vector<32x32xf32>
    %132 = vector.broadcast %124 : vector<32x1xf32> to vector<32x32xf32>
    %133 = arith.addf %131, %132 : vector<32x32xf32>
    %cst_94 = arith.constant 0.000000e+00 : f32
    %134 = vector.broadcast %cst_94 : f32 to vector<32x32xf32>
    %135 = arith.maximumf %133, %134 : vector<32x32xf32>
    %c5_95 = arith.constant 5 : index
    %c0_96 = arith.constant 0 : index
    %c0_97 = arith.constant 0 : index
    %136 = vector.load %arg9[%c5_95, %c0_96, %c0_97] : memref<7x32x1xf32, #tpu.memory_space<vmem>>, vector<1x32x1xf32>
    %137 = vector.shape_cast %136 : vector<1x32x1xf32> to vector<32x1xf32>
    %138 = arith.truncf %135 : vector<32x32xf32> to vector<32x32xbf16>
    %cst_98 = arith.constant dense<0.000000e+00> : vector<32x32xf32>
    %139 = tpu.matmul %138, %110, %cst_98 {dimension_numbers = #tpu.dot_dimension_numbers<[1], [0], [0], [1], [0, 0, 1, 1], [], []>} : vector<32x32xbf16>, vector<32x32xbf16>, vector<32x32xf32> -> vector<32x32xf32>
    %cst_99 = arith.constant dense<0.000000e+00> : vector<32x32xf32>
    %140 = tpu.matmul %138, %112, %cst_99 {dimension_numbers = #tpu.dot_dimension_numbers<[1], [0], [0], [1], [0, 0, 1, 1], [], []>} : vector<32x32xbf16>, vector<32x32xbf16>, vector<32x32xf32> -> vector<32x32xf32>
    %cst_100 = arith.constant dense<0.000000e+00> : vector<32x32xf32>
    %141 = tpu.matmul %138, %114, %cst_100 {dimension_numbers = #tpu.dot_dimension_numbers<[1], [0], [0], [1], [0, 0, 1, 1], [], []>} : vector<32x32xbf16>, vector<32x32xbf16>, vector<32x32xf32> -> vector<32x32xf32>
    %142 = tpu.concatenate %139, %140, %141 in 0 : vector<32x32xf32>, vector<32x32xf32>, vector<32x32xf32> -> vector<96x32xf32>
    %143 = arith.truncf %142 : vector<96x32xf32> to vector<96x32xbf16>
    %cst_101 = arith.constant dense<0.000000e+00> : vector<32x32xf32>
    %144 = tpu.matmul %103, %143, %cst_101 {dimension_numbers = #tpu.dot_dimension_numbers<[1], [0], [0], [1], [0, 0, 1, 1], [], []>} : vector<32x96xbf16>, vector<96x32xbf16>, vector<32x32xf32> -> vector<32x32xf32>
    %145 = vector.broadcast %137 : vector<32x1xf32> to vector<32x32xf32>
    %146 = arith.addf %144, %145 : vector<32x32xf32>
    %cst_102 = arith.constant 0.000000e+00 : f32
    %147 = vector.broadcast %cst_102 : f32 to vector<32x32xf32>
    %148 = arith.maximumf %146, %147 : vector<32x32xf32>
    %149 = arith.addf %148, %97 : vector<32x32xf32>
    %c2_103 = arith.constant 2 : index
    %c0_104 = arith.constant 0 : index
    %c0_105 = arith.constant 0 : index
    %150 = vector.load %arg9[%c2_103, %c0_104, %c0_105] : memref<7x32x1xf32, #tpu.memory_space<vmem>>, vector<1x32x1xf32>
    %151 = vector.shape_cast %150 : vector<1x32x1xf32> to vector<32x1xf32>
    %152 = vector.broadcast %151 : vector<32x1xf32> to vector<32x32xf32>
    %153 = arith.mulf %152, %149 : vector<32x32xf32>
    %c3_106 = arith.constant 3 : index
    %c0_107 = arith.constant 0 : index
    %c0_108 = arith.constant 0 : index
    %154 = vector.load %arg9[%c3_106, %c0_107, %c0_108] : memref<7x32x1xf32, #tpu.memory_space<vmem>>, vector<1x32x1xf32>
    %155 = vector.shape_cast %154 : vector<1x32x1xf32> to vector<32x1xf32>
    %156 = vector.broadcast %155 : vector<32x1xf32> to vector<32x32xf32>
    %157 = arith.addf %153, %156 : vector<32x32xf32>
    %c6_109 = arith.constant 6 : index
    %c0_110 = arith.constant 0 : index
    %c0_111 = arith.constant 0 : index
    %158 = vector.load %arg9[%c6_109, %c0_110, %c0_111] : memref<7x32x1xf32, #tpu.memory_space<vmem>>, vector<1x32x1xf32>
    %159 = vector.shape_cast %158 : vector<1x32x1xf32> to vector<32x1xf32>
    %160 = arith.truncf %157 : vector<32x32xf32> to vector<32x32xbf16>
    %cst_112 = arith.constant dense<0.000000e+00> : vector<32x32xf32>
    %161 = tpu.matmul %160, %110, %cst_112 {dimension_numbers = #tpu.dot_dimension_numbers<[1], [0], [0], [1], [0, 0, 1, 1], [], []>} : vector<32x32xbf16>, vector<32x32xbf16>, vector<32x32xf32> -> vector<32x32xf32>
    %cst_113 = arith.constant dense<0.000000e+00> : vector<32x32xf32>
    %162 = tpu.matmul %160, %112, %cst_113 {dimension_numbers = #tpu.dot_dimension_numbers<[1], [0], [0], [1], [0, 0, 1, 1], [], []>} : vector<32x32xbf16>, vector<32x32xbf16>, vector<32x32xf32> -> vector<32x32xf32>
    %cst_114 = arith.constant dense<0.000000e+00> : vector<32x32xf32>
    %163 = tpu.matmul %160, %114, %cst_114 {dimension_numbers = #tpu.dot_dimension_numbers<[1], [0], [0], [1], [0, 0, 1, 1], [], []>} : vector<32x32xbf16>, vector<32x32xbf16>, vector<32x32xf32> -> vector<32x32xf32>
    %164 = tpu.concatenate %161, %162, %163 in 0 : vector<32x32xf32>, vector<32x32xf32>, vector<32x32xf32> -> vector<96x32xf32>
    %165 = arith.truncf %164 : vector<96x32xf32> to vector<96x32xbf16>
    %cst_115 = arith.constant dense<0.000000e+00> : vector<32x32xf32>
    %166 = tpu.matmul %106, %165, %cst_115 {dimension_numbers = #tpu.dot_dimension_numbers<[1], [0], [0], [1], [0, 0, 1, 1], [], []>} : vector<32x96xbf16>, vector<96x32xbf16>, vector<32x32xf32> -> vector<32x32xf32>
    %167 = vector.broadcast %159 : vector<32x1xf32> to vector<32x32xf32>
    %168 = arith.addf %166, %167 : vector<32x32xf32>
    %cst_116 = arith.constant 0.000000e+00 : f32
    %169 = vector.broadcast %cst_116 : f32 to vector<32x32xf32>
    %170 = arith.maximumf %168, %169 : vector<32x32xf32>
    %c0_117 = arith.constant 0 : index
    %c0_118 = arith.constant 0 : index
    %171 = vector.load %arg10[%c0_117, %c0_118] : memref<32x1xf32, #tpu.memory_space<vmem>>, vector<32x1xf32>
    %172 = arith.truncf %170 : vector<32x32xf32> to vector<32x32xbf16>
    %cst_119 = arith.constant dense<0.000000e+00> : vector<32x32xf32>
    %173 = tpu.matmul %172, %110, %cst_119 {dimension_numbers = #tpu.dot_dimension_numbers<[1], [0], [0], [1], [0, 0, 1, 1], [], []>} : vector<32x32xbf16>, vector<32x32xbf16>, vector<32x32xf32> -> vector<32x32xf32>
    %cst_120 = arith.constant dense<0.000000e+00> : vector<32x32xf32>
    %174 = tpu.matmul %172, %112, %cst_120 {dimension_numbers = #tpu.dot_dimension_numbers<[1], [0], [0], [1], [0, 0, 1, 1], [], []>} : vector<32x32xbf16>, vector<32x32xbf16>, vector<32x32xf32> -> vector<32x32xf32>
    %cst_121 = arith.constant dense<0.000000e+00> : vector<32x32xf32>
    %175 = tpu.matmul %172, %114, %cst_121 {dimension_numbers = #tpu.dot_dimension_numbers<[1], [0], [0], [1], [0, 0, 1, 1], [], []>} : vector<32x32xbf16>, vector<32x32xbf16>, vector<32x32xf32> -> vector<32x32xf32>
    %176 = tpu.concatenate %173, %174, %175 in 0 : vector<32x32xf32>, vector<32x32xf32>, vector<32x32xf32> -> vector<96x32xf32>
    %177 = arith.truncf %176 : vector<96x32xf32> to vector<96x32xbf16>
    %cst_122 = arith.constant dense<0.000000e+00> : vector<32x32xf32>
    %178 = tpu.matmul %108, %177, %cst_122 {dimension_numbers = #tpu.dot_dimension_numbers<[1], [0], [0], [1], [0, 0, 1, 1], [], []>} : vector<32x96xbf16>, vector<96x32xbf16>, vector<32x32xf32> -> vector<32x32xf32>
    %179 = vector.broadcast %171 : vector<32x1xf32> to vector<32x32xf32>
    %180 = arith.addf %178, %179 : vector<32x32xf32>
    %cst_123 = arith.constant 0.000000e+00 : f32
    %181 = vector.broadcast %cst_123 : f32 to vector<32x32xf32>
    %182 = arith.maximumf %180, %181 : vector<32x32xf32>
    %183 = arith.addf %182, %97 : vector<32x32xf32>
    %184 = vector.extract_strided_slice %183 {offsets = [0, 0], sizes = [32, 16], strides = [1, 1]} : vector<32x32xf32> to vector<32x16xf32>
    %185 = tpu.transpose %184, [1, 0] : vector<32x16xf32> -> vector<16x32xf32>
    %c0_124 = arith.constant 0 : index
    %c0_125 = arith.constant 0 : index
    %c0_126 = arith.constant 0 : index
    %186 = vector.load %arg12[%c0_124, %c0_125, %c0_126] : memref<2x16x32xf32, #tpu.memory_space<vmem>>, vector<1x16x32xf32>
    %187 = vector.shape_cast %186 : vector<1x16x32xf32> to vector<16x32xf32>
    %188 = vector.shape_cast %185 : vector<16x32xf32> to vector<1x16x32xf32>
    tpu.vector_store %arg12[%c0_124, %c0_125, %c0_126], %188 {strides = array<i32>} : memref<2x16x32xf32, #tpu.memory_space<vmem>>, vector<1x16x32xf32>,
    %189 = vector.extract_strided_slice %183 {offsets = [0, 16], sizes = [32, 16], strides = [1, 1]} : vector<32x32xf32> to vector<32x16xf32>
    %190 = tpu.transpose %189, [1, 0] : vector<32x16xf32> -> vector<16x32xf32>
    %c1_127 = arith.constant 1 : index
    %c0_128 = arith.constant 0 : index
    %c0_129 = arith.constant 0 : index
    %191 = vector.load %arg12[%c1_127, %c0_128, %c0_129] : memref<2x16x32xf32, #tpu.memory_space<vmem>>, vector<1x16x32xf32>
    %192 = vector.shape_cast %191 : vector<1x16x32xf32> to vector<16x32xf32>
    %193 = vector.shape_cast %190 : vector<16x32xf32> to vector<1x16x32xf32>
    tpu.vector_store %arg12[%c1_127, %c0_128, %c0_129], %193 {strides = array<i32>} : memref<2x16x32xf32, #tpu.memory_space<vmem>>, vector<1x16x32xf32>,
    return
  }
  func.func @transform_0(%arg0: i32) -> (i32, i32, i32) {
    %c0_i32 = arith.constant 0 : i32
    %c0_i32_0 = arith.constant 0 : i32
    %c0_i32_1 = arith.constant 0 : i32
    return %arg0, %c0_i32, %c0_i32_0 : i32, i32, i32
  }
  func.func @transform_1(%arg0: i32) -> (i32, i32, i32) {
    %c0_i32 = arith.constant 0 : i32
    %c0_i32_0 = arith.constant 0 : i32
    %c0_i32_1 = arith.constant 0 : i32
    %c0_i32_2 = arith.constant 0 : i32
    return %c0_i32, %c0_i32_0, %c0_i32_1 : i32, i32, i32
  }
  func.func @transform_2(%arg0: i32) -> (i32, i32) {
    %c0_i32 = arith.constant 0 : i32
    %c0_i32_0 = arith.constant 0 : i32
    %c0_i32_1 = arith.constant 0 : i32
    return %c0_i32, %c0_i32_0 : i32, i32
  }
  func.func @transform_3(%arg0: i32) -> (i32, i32, i32) {
    %c0_i32 = arith.constant 0 : i32
    %c0_i32_0 = arith.constant 0 : i32
    %c0_i32_1 = arith.constant 0 : i32
    %c0_i32_2 = arith.constant 0 : i32
    return %c0_i32, %c0_i32_0, %c0_i32_1 : i32, i32, i32
  }
  func.func @transform_4(%arg0: i32) -> (i32, i32) {
    %c0_i32 = arith.constant 0 : i32
    %c0_i32_0 = arith.constant 0 : i32
    %c0_i32_1 = arith.constant 0 : i32
    return %c0_i32, %c0_i32_0 : i32, i32
  }
  func.func @transform_5(%arg0: i32) -> (i32, i32, i32) {
    %c0_i32 = arith.constant 0 : i32
    %c0_i32_0 = arith.constant 0 : i32
    %c0_i32_1 = arith.constant 0 : i32
    %c0_i32_2 = arith.constant 0 : i32
    return %c0_i32, %c0_i32_0, %c0_i32_1 : i32, i32, i32
  }
  func.func @transform_6(%arg0: i32) -> (i32, i32, i32) {
    %c0_i32 = arith.constant 0 : i32
    %c0_i32_0 = arith.constant 0 : i32
    %c0_i32_1 = arith.constant 0 : i32
    %c0_i32_2 = arith.constant 0 : i32
    return %c0_i32, %c0_i32_0, %c0_i32_1 : i32, i32, i32
  }
  func.func @transform_7(%arg0: i32) -> (i32, i32) {
    %c0_i32 = arith.constant 0 : i32
    %c0_i32_0 = arith.constant 0 : i32
    %c0_i32_1 = arith.constant 0 : i32
    return %c0_i32, %c0_i32_0 : i32, i32
  }
  func.func @transform_8(%arg0: i32) -> (i32, i32, i32) {
    %c0_i32 = arith.constant 0 : i32
    %c0_i32_0 = arith.constant 0 : i32
    %c0_i32_1 = arith.constant 0 : i32
    %c0_i32_2 = arith.constant 0 : i32
    return %c0_i32, %c0_i32_0, %c0_i32_1 : i32, i32, i32
  }
  func.func @transform_9(%arg0: i32) -> (i32, i32) {
    %c0_i32 = arith.constant 0 : i32
    %c0_i32_0 = arith.constant 0 : i32
    %c0_i32_1 = arith.constant 0 : i32
    return %c0_i32, %c0_i32_0 : i32, i32
  }
  func.func @transform_10(%arg0: i32) -> (i32, i32, i32) {
    %c0_i32 = arith.constant 0 : i32
    %c0_i32_0 = arith.constant 0 : i32
    %c0_i32_1 = arith.constant 0 : i32
    %c0_i32_2 = arith.constant 0 : i32
    return %c0_i32, %c0_i32_0, %c0_i32_1 : i32, i32, i32
  }
  func.func @transform_11(%arg0: i32) -> (i32, i32, i32) {
    %c0_i32 = arith.constant 0 : i32
    %c0_i32_0 = arith.constant 0 : i32
    %c0_i32_1 = arith.constant 0 : i32
    return %arg0, %c0_i32, %c0_i32_0 : i32, i32, i32
  }
}

</mosaic_0001>

<bundles_post_ra>
// kernel: encoder_layer_forward.1
= control target key start
LH: loop header
LB: loop body
LE: loop exit
PB: predicated region body
PF: predicated region fallthrough
CT: control target
= control target key end

     0   :  { %v3044_v2 = vmov 0   ;;  %v3045_v5 = vmov 0.0   ;;  %s3046_s18 = smov 32   ;;  %vm3047_vm0 = vmmov 0   ;;  %s3724_s0 = inlined_call_operand.vmem [shape: f32[2,16,32], index: 0, kind: input, shape index: {}]   ;;  %s3725_s1 = inlined_call_operand.vmem [shape: f32[3,16,48], index: 1, kind: input, shape index: {}]   ;;  %s3726_s2 = inlined_call_operand.vmem [shape: f32[8,48], index: 2, kind: input, shape index: {}]   ;;  %s3727_s3 = inlined_call_operand.vmem [shape: f32[7,16,1], index: 3, kind: input, shape index: {}]   ;;  %s3728_s4 = inlined_call_operand.vmem [shape: f32[8,1], index: 4, kind: input, shape index: {}]   ;;  %s3729_s5 = inlined_call_operand.vmem [shape: bf16[3,64,64], index: 5, kind: input, shape index: {}]   ;;  %s3730_s6 = inlined_call_operand.vmem [shape: f32[3,32,96], index: 6, kind: input, shape index: {}]   ;;  %s3731_s7 = inlined_call_operand.vmem [shape: f32[32,96], index: 7, kind: input, shape index: {}]   ;;  %s3732_s8 = inlined_call_operand.vmem [shape: f32[7,32,1], index: 8, kind: input, shape index: {}]   ;;  %s3733_s9 = inlined_call_operand.vmem [shape: f32[32,1], index: 9, kind: input, shape index: {}]   ;;  %s3734_s10 = inlined_call_operand.vmem [shape: bf16[3,32,32], index: 10, kind: input, shape index: {}]   ;;  %s3735_s11 = inlined_call_operand.hbm [shape: f32[2,16,32], index: 11, kind: output, shape index: {}]  }
   0x1   :  { %v2374_v0 = vld [vmem:[%s3727_s3 + $0x10] sm:$0xff]  ;;  %v95_v1 = vld [vmem:[%s3727_s3] sm:$0xff]  ;;  %3003 = vset.pattern.permute.xlu1 %v3044_v2  ;;  %3002 = vset.pattern.permute.xlu0 %v3044_v2  ;;  %v2375_v3 = vld [vmem:[%s3727_s3 + $0x18] sm:$0xff] }
   0x2   :  { %114 = vperm.xlu1 %3003, %v2374_v0   ;;  %99 = vperm.xlu0 %3002, %v95_v1   ;;  %v96_v4 = vld [vmem:[%s3727_s3 + $0x8] sm:$0xff]  ;;  %v2353_v6 = vld [vmem:[%s3724_s0 + $0x18] sm:$0xff]  ;;  %v2352_v7 = vld [vmem:[%s3724_s0 + $0x10] sm:$0xff] }
   0x3   :  { %2648 = vmatprep.subr.bf16.mxu0 %v3045_v5  ;;  %2660 = vmatprep.subr.bf16.mxu1 %v3045_v5  ;;  %v3137_v8 = vld [vmem:[%s3729_s5 + $0x18] sm:$0xff]   ;;  %v3148_v10 = vld [vmem:[%s3729_s5 + $0x10] sm:$0xff]   ;;  %v2377_v12 = vld [vmem:[%s3727_s3 + $0x48] sm:$0xff] }
   0x4   :  { %v3142_v9 = vld [vmem:[%s3729_s5 + $0x38] sm:$0xff]   ;;  %2649 = vmatpush3.bf16.msra.mxu0 %v3137_v8  ;;  %v3155_v11 = vld [vmem:[%s3729_s5 + $0x30] sm:$0xff]   ;;  %v2376_v13 = vld [vmem:[%s3727_s3 + $0x40] sm:$0xff]  ;;  %2656 = vmatprep.mubr.msk.bf16.mxu0 %vm3047_vm0, %v3045_v5 }
   0x5   :  { %2661 = vmatpush3.bf16.msra.mxu1 %v3142_v9  ;;  %2650 = vmatprep.subr.bf16.mxu0 %v3045_v5  ;;  %v3170_v14 = vld [vmem:[%s3729_s5 + $0x8] sm:$0xff]   ;;  %v2395_v15 = vld [vmem:[%s3727_s3 + $0x58] sm:$0xff]  ;;  %v2394_v17 = vld [vmem:[%s3727_s3 + $0x50] sm:$0xff] }
   0x6   :  { %119 = vperm.xlu1 %3003, %v2375_v3   ;;  %104 = vperm.xlu0 %3002, %v96_v4   ;;  %v3182_v16 = vld [vmem:[%s3729_s5 + $0x28] sm:$0xff]   ;;  %v3191_v18 = vld [vmem:[%s3729_s5] sm:$0xff]  }
   0x7   :  { %2662 = vmatprep.subr.bf16.mxu1 %v3045_v5  ;;  %2668 = vmatprep.mubr.msk.bf16.mxu1 %vm3047_vm0, %v3045_v5  ;;  %v3197_v19 = vld [vmem:[%s3729_s5 + $0x20] sm:$0xff]   ;;  %v2401_v20 = vld [vmem:[%s3727_s3 + $0x28] sm:$0xff] }
   0x8   :  { %2651 = vmatpush3.bf16.msra.mxu0 %v3148_v10  ;;  %v2400_v21 = vld [vmem:[%s3727_s3 + $0x20] sm:$0xff] }
   0x9   :  { %2663 = vmatpush3.bf16.msra.mxu1 %v3155_v11  ;;  %2652 = vmatprep.subr.bf16.mxu0 %v3045_v5 }
   0xa   :  { %49 = vrot.lane.b32.xlu1 %v2353_v6, %s3046_s18  ;;  %47 = vrot.lane.b32.xlu0 %v2352_v7, %s3046_s18 }
   0xb   :  { %2664 = vmatprep.subr.bf16.mxu1 %v3045_v5 }
   0xc   :  { %2653 = vmatpush3.bf16.msra.mxu0 %v3170_v14 }
   0xd   :  { %2665 = vmatpush3.bf16.msra.mxu1 %v3182_v16  ;;  %2654 = vmatprep.subr.bf16.mxu0 %v3045_v5 }
   0xe   :  { %337 = vperm.xlu1 %3003, %v2377_v12   ;;  %332 = vperm.xlu0 %3002, %v2376_v13  }
   0xf   :  { %2666 = vmatprep.subr.bf16.mxu1 %v3045_v5 }
  0x10   :  { %2655 = vmatpush3.bf16.msra.mxu0 %v3191_v18 }
  0x11   :  { %2667 = vmatpush3.bf16.msra.mxu1 %v3197_v19  ;;  %2672 = vmatprep.subr.bf16.mxu0 %v3045_v5 }
  0x12   :  { %527 = vperm.xlu1 %3003, %v2395_v15   ;;  %522 = vperm.xlu0 %3002, %v2394_v17  }
  0x16   :  { %588 = vperm.xlu1 %3003, %v2401_v20   ;;  %583 = vperm.xlu0 %3002, %v2400_v21  }
  0x17   :  { %16 = vsyncpa [#allocation3], 0  ;;  %v2403_v22 = vld [vmem:[%s3727_s3 + $0x38] sm:$0xff]  ;;  %v2402_v23 = vld [vmem:[%s3727_s3 + $0x30] sm:$0xff]  ;;  %2684 = vmatprep.subr.bf16.mxu1 %v3045_v5  ;;  %vm53_vm1 = vcmask 261120   ;;  %vm152_vm2 = vcmask 523264  }
  0x18   :  { %v2405_v24 = vld [vmem:[%s3727_s3 + $0x68] sm:$0xff]  ;;  %v2404_v25 = vld [vmem:[%s3727_s3 + $0x60] sm:$0xff]  ;;  %s3048_s3 = smov 96   ;;  %v3250_v42 = vld [vmem:[%s3729_s5 + $0x58] sm:$0xff]   ;;  %vm340_vm3 = vcmask 392192   ;;  %s3049_s25 = smov 16  }
  0x19   :  { %v797_v26 = vld [vmem:[%s3728_s4] sm:$0xff]  ;;  %v41_v31 = vld [vmem:[%s3724_s0 + $0x8] sm:$0xff]  ;;  %v3258_v44 = vld [vmem:[%s3729_s5 + $0x50] sm:$0xff]   ;;  %vm1067_vm4 = vcmask 130048   ;;  %vm1391_vm5 = vcmask 785408  }
  0x1a   :  { %603 = vperm.xlu1 %3003, %v2403_v22   ;;  %598 = vperm.xlu0 %3002, %v2402_v23   ;;  %v40_v32 = vld [vmem:[%s3724_s0] sm:$0xff]  ;;  %v3269_v45 = vld [vmem:[%s3729_s5 + $0x48] sm:$0xff]   ;;  %s3051_s0 = smov [#allocation2]  }
  0x1b   :  { %v3276_v46 = vld [vmem:[%s3729_s5 + $0x40] sm:$0xff]   ;;  %v57_v4 = vld [vmem:[%s3725_s1 + $0x8] sm:$0xff]  ;;  %s2341_s4 = sshll.u32 %s3051_s0, 4  ;;  %s2342_s4 = int_to_ptr.vmem [resolvable:$true] %s2341_s4 }
  0x1c   :  { %v56_v3 = vld [vmem:[%s3725_s1] sm:$0xff]  ;;  %s3022_s15 = scalar_lea.vmem %s2342_s4, 512  ;;  %p3027_p1 = scmp.lt.s32.totalorder %s2342_s4, %s2342_s4 }
  0x1d   :  { %v58_v7 = vpack.c.bf16 %v57_v4, %v56_v3  ;;  %p3023_p0 = scmp.ne.s32.totalorder %s2342_s4, %s3022_s15  ;;  %p3028_p2 = scmp.lt.s32.totalorder %s3022_s15, %s3022_s15 }
  0x1e   :  { %748 = vperm.xlu1 %3003, %v2405_v24   ;;  %743 = vperm.xlu0 %3002, %v2404_v25  }
  0x1f   :  { %p3029_p3 = por %p3028_p2, %p3027_p1 }
  0x21   :  { %p3030_p4 = pnand %p3029_p3, %p3023_p0 }
  0x22   :  { %930 = vperm.xlu0 %3002, %v797_v26  }
  0x7d   :  { %v115_v27 = vpop.permute.xlu1 %114  ;;  %v100_v28 = vpop.permute.xlu0 %99 }
  0x81   :  { %v120_v29 = vpop.permute.xlu1 %119  ;;  %v105_v30 = vpop.permute.xlu0 %104 }
  0x85   :  { %v50_v33 = vpop.permute.xlu1 %49  ;;  %v48_v34 = vpop.permute.xlu0 %47 }
  0x86   :  { %v3234_v35 = vsel %vm53_vm1, %v41_v31, %v50_v33  ;;  %v3237_v36 = vsel %vm53_vm1, %v40_v32, %v48_v34 }
  0x87   :  { %v108_v37 = vmul.f32 %v105_v30, %v3234_v35  ;;  %v107_v38 = vmul.f32 %v100_v28, %v3237_v36  ;;  %v3243_v39 = vadd.f32 %v3237_v36, %v3237_v36 }
  0x89   :  { %v123_v40 = vadd.f32 %v120_v29, %v108_v37  ;;  %v122_v41 = vadd.f32 %v115_v27, %v107_v38  ;;  %1013 = vrot.lane.b32.xlu1 %v3243_v39, %s3048_s3  ;;  %v338_v47 = vpop.permute.xlu1 %337  ;;  %v333_v13 = vpop.permute.xlu0 %332 }
  0x8b   :  { %v127_v43 = vpack.c.bf16 %v123_v40, %v122_v41 }
  0x8d   :  { %2657 = vmatmul.mubr.msk.bf16.vlgmr.msra.gmra.mxu0 %vm152_vm2, %v127_v43  ;;  %2669 = vmatmul.mubr.msk.bf16.vlgmr.msra.gmra.mxu1 %vm152_vm2, %v127_v43  ;;  %v3292_v48 = vpop.permute.xlu1 %527 }
  0x8e   :  { %2673 = vmatpush3.bf16.msra.mxu0 %v3250_v42  ;;  %2680 = vmatprep.mubr.msk.bf16.mxu0 %vm3047_vm0, %v3045_v5 }
  0x8f   :  { %2674 = vmatprep.subr.bf16.mxu0 %v3045_v5  ;;  %2690 = vmatprep.mubr.msk.bf16.mxu1 %vm3047_vm0, %v3045_v5 }
  0x91   :  { %v3294_v49 = vpop.permute.xlu1 %588 }
  0x92   :  { %2675 = vmatpush3.bf16.msra.mxu0 %v3258_v44 }
  0x93   :  { %2676 = vmatprep.subr.bf16.mxu0 %v3045_v5 }
  0x95   :  { %v3296_v50 = vpop.permute.xlu1 %603 }
  0x96   :  { %2677 = vmatpush3.bf16.msra.mxu0 %v3269_v45 }
  0x97   :  { %2678 = vmatprep.subr.bf16.mxu0 %v3045_v5 }
  0x99   :  { %v3298_v51 = vpop.permute.xlu1 %748 }
  0x9a   :  { %2679 = vmatpush3.bf16.msra.mxu0 %v3276_v46 }
  0x9b   :  { %2706 = vmatprep.subr.bf16.mxu0 %v3045_v5 }
  0x9d   :  { %2681 = vmatmul.mubr.msk.bf16.vlgmr.msra.gmra.mxu0 %vm152_vm2, %v127_v43 }
  0x9e   :  { %2707 = vmatpush3.bf16.msra.mxu0 %v3142_v9  ;;  %2714 = vmatprep.mubr.msk.bf16.mxu0 %vm3047_vm0, %v3045_v5 }
  0x9f   :  { %2708 = vmatprep.subr.bf16.mxu0 %v3045_v5 }
  0xa2   :  { %2709 = vmatpush3.bf16.msra.mxu0 %v3155_v11 }
  0xa3   :  { %2710 = vmatprep.subr.bf16.mxu0 %v3045_v5 }
  0xa6   :  { %2711 = vmatpush3.bf16.msra.mxu0 %v3182_v16 }
  0xa7   :  { %2712 = vmatprep.subr.bf16.mxu0 %v3045_v5 }
  0xaa   :  { %2713 = vmatpush3.bf16.msra.mxu0 %v3197_v19 }
  0xab   :  { %2730 = vmatprep.subr.bf16.mxu0 %v3045_v5 }
  0xfb   :  { %v1014_v52 = vpop.permute.xlu1 %1013 }
  0xfc   :  { %1019 = vxpose.xlu1.b32.start [1/2] (short) (narrow) %v1014_v52, 32  ;;  %v2355_v52 = vld [vmem:[%s3725_s1 + $0x18] sm:$0xff] }
 0x14d   :  { %v190_v53 = vpop.f32.mrf.mxu0  ;;  %v255_v54 = vpop.f32.mrf.mxu1 }
 0x14f   :  { %v2658_v55 = vpop.f32.mrf.mxu0  ;;  %v2670_v56 = vpop.f32.mrf.mxu1 }
 0x150   :  { %v523_v55 = vpop.permute.xlu0 %522 }
 0x151   :  { %v193_v57 = vpop.f32.mrf.mxu0  ;;  %v258_v58 = vpop.f32.mrf.mxu1 }
 0x152   :  { %v328_v2 = vpack.c.bf16 %v258_v58, %v255_v54  ;;  %v327_v6 = vpack.c.bf16 %v193_v57, %v190_v53 }
 0x153   :  { %v2659_v59 = vpop.f32.mrf.mxu0  ;;  %v2671_v60 = vpop.f32.mrf.mxu1 }
 0x15d   :  { %v320_v61 = vpop.f32.mrf.mxu0 }
 0x15f   :  { %v2682_v62 = vpop.f32.mrf.mxu0 }
 0x161   :  { %v323_v63 = vpop.f32.mrf.mxu0 }
 0x162   :  { %v329_v0 = vpack.c.bf16 %v323_v63, %v320_v61  ;;  %v584_v63 = vpop.permute.xlu0 %583 }
 0x163   :  { %v2683_v1 = vpop.f32.mrf.mxu0 }
 0x164   :  { %2685 = vmatpush3.bf16.msra.mxu1 %v329_v0 }
 0x165   :  { %2686 = vmatprep.subr.bf16.mxu1 %v3045_v5 }
 0x168   :  { %2687 = vmatpush3.bf16.msra.mxu1 %v328_v2 }
 0x169   :  { %2688 = vmatprep.subr.bf16.mxu1 %v3045_v5 }
 0x16c   :  { %2689 = vmatpush3.bf16.msra.mxu1 %v327_v6  ;;  %v599_v6 = vpop.permute.xlu0 %598 }
 0x16d   :  { %2694 = vmatprep.subr.bf16.mxu1 %v3045_v5 }
 0x16f   :  { %2691 = vmatmul.mubr.msk.bf16.vlgmr.msra.gmra.mxu1 %vm340_vm3, %v58_v7 }
 0x170   :  { %2695 = vmatpush3.bf16.msra.mxu1 %v3137_v8  ;;  %2702 = vmatprep.mubr.msk.bf16.mxu1 %vm3047_vm0, %v3045_v5 }
 0x171   :  { %2696 = vmatprep.subr.bf16.mxu1 %v3045_v5 }
 0x174   :  { %2697 = vmatpush3.bf16.msra.mxu1 %v3148_v10 }
 0x175   :  { %2698 = vmatprep.subr.bf16.mxu1 %v3045_v5 }
 0x178   :  { %2699 = vmatpush3.bf16.msra.mxu1 %v3170_v14 }
 0x179   :  { %2700 = vmatprep.subr.bf16.mxu1 %v3045_v5 }
 0x17c   :  { %2701 = vmatpush3.bf16.msra.mxu1 %v3191_v18 }
 0x17d   :  { %2718 = vmatprep.subr.bf16.mxu1 %v3045_v5 }
 0x22f   :  { %v378_v12 = vpop.f32.mrf.mxu1 }
 0x230   :  { %v379_v17 = vadd.f32 %v378_v12, %v333_v13 }
 0x231   :  { %v2692_v15 = vpop.f32.mrf.mxu1 }
 0x232   :  { %v385_v23 = vmax.f32 %v379_v17, 0.0 }
 0x233   :  { %v381_v20 = vpop.f32.mrf.mxu1 }
 0x234   :  { %v382_v21 = vadd.f32 %v381_v20, %v338_v47  ;;  %v2354_v47 = vld [vmem:[%s3725_s1 + $0x10] sm:$0xff] }
 0x235   :  { %v2693_v22 = vpop.f32.mrf.mxu1  ;;  %v62_v54 = vpack.c.bf16 %v2355_v52, %v2354_v47 }
 0x236   :  { %v386_v24 = vmax.f32 %v382_v21, 0.0 }
 0x238   :  { %v390_v25 = vpack.c.bf16 %v386_v24, %v385_v23 }
 0x23a   :  { %2703 = vmatmul.mubr.msk.bf16.vlgmr.msra.gmra.mxu1 %vm152_vm2, %v390_v25  ;;  %2715 = vmatmul.mubr.msk.bf16.vlgmr.msra.gmra.mxu0 %vm152_vm2, %v390_v25 }
 0x23b   :  { %2719 = vmatpush3.bf16.msra.mxu1 %v3250_v42  ;;  %2726 = vmatprep.mubr.msk.bf16.mxu1 %vm3047_vm0, %v3045_v5 }
 0x23c   :  { %2720 = vmatprep.subr.bf16.mxu1 %v3045_v5  ;;  %2736 = vmatprep.mubr.msk.bf16.mxu0 %vm3047_vm0, %v3045_v5 }
 0x23f   :  { %2721 = vmatpush3.bf16.msra.mxu1 %v3258_v44 }
 0x240   :  { %2722 = vmatprep.subr.bf16.mxu1 %v3045_v5 }
 0x243   :  { %2723 = vmatpush3.bf16.msra.mxu1 %v3269_v45 }
 0x244   :  { %2724 = vmatprep.subr.bf16.mxu1 %v3045_v5 }
 0x247   :  { %2725 = vmatpush3.bf16.msra.mxu1 %v3276_v46 }
 0x248   :  { %2752 = vmatprep.subr.bf16.mxu1 %v3045_v5 }
 0x24a   :  { %2727 = vmatmul.mubr.msk.bf16.vlgmr.msra.gmra.mxu1 %vm152_vm2, %v390_v25  ;;  %v2357_v25 = vld [vmem:[%s3725_s1 + $0x28] sm:$0xff] }
 0x24b   :  { %2753 = vmatpush3.bf16.msra.mxu1 %v3142_v9  ;;  %2760 = vmatprep.mubr.msk.bf16.mxu1 %vm3047_vm0, %v3045_v5 }
 0x24c   :  { %2754 = vmatprep.subr.bf16.mxu1 %v3045_v5 }
 0x24f   :  { %2755 = vmatpush3.bf16.msra.mxu1 %v3155_v11 }
 0x250   :  { %2756 = vmatprep.subr.bf16.mxu1 %v3045_v5 }
 0x253   :  { %2757 = vmatpush3.bf16.msra.mxu1 %v3182_v16 }
 0x254   :  { %2758 = vmatprep.subr.bf16.mxu1 %v3045_v5 }
 0x257   :  { %2759 = vmatpush3.bf16.msra.mxu1 %v3197_v19 }
 0x258   :  { %2776 = vmatprep.subr.bf16.mxu1 %v3045_v5 }
 0x2fa   :  { %v428_v26 = vpop.f32.mrf.mxu1  ;;  %v469_v27 = vpop.f32.mrf.mxu0 }
 0x2fc   :  { %v2704_v28 = vpop.f32.mrf.mxu1  ;;  %v2716_v29 = vpop.f32.mrf.mxu0 }
 0x2fd   :  { %v744_v29 = vpop.permute.xlu0 %743 }
 0x2fe   :  { %v431_v30 = vpop.f32.mrf.mxu1  ;;  %v472_v31 = vpop.f32.mrf.mxu0 }
 0x2ff   :  { %v518_v43 = vpack.c.bf16 %v472_v31, %v469_v27  ;;  %v517_v53 = vpack.c.bf16 %v431_v30, %v428_v26 }
 0x300   :  { %v2705_v32 = vpop.f32.mrf.mxu1  ;;  %v2717_v33 = vpop.f32.mrf.mxu0 }
 0x30a   :  { %v510_v34 = vpop.f32.mrf.mxu1 }
 0x30c   :  { %v2728_v37 = vpop.f32.mrf.mxu1 }
 0x30e   :  { %v513_v38 = vpop.f32.mrf.mxu1 }
 0x30f   :  { %v519_v40 = vpack.c.bf16 %v513_v38, %v510_v34 }
 0x310   :  { %v2729_v41 = vpop.f32.mrf.mxu1 }
 0x311   :  { %2731 = vmatpush3.bf16.msra.mxu0 %v519_v40 }
 0x312   :  { %2732 = vmatprep.subr.bf16.mxu0 %v3045_v5 }
 0x315   :  { %2733 = vmatpush3.bf16.msra.mxu0 %v518_v43 }
 0x316   :  { %2734 = vmatprep.subr.bf16.mxu0 %v3045_v5 }
 0x319   :  { %2735 = vmatpush3.bf16.msra.mxu0 %v517_v53 }
 0x31a   :  { %2740 = vmatprep.subr.bf16.mxu0 %v3045_v5 }
 0x31c   :  { %2737 = vmatmul.mubr.msk.bf16.vlgmr.msra.gmra.mxu0 %vm340_vm3, %v62_v54 }
 0x31d   :  { %2741 = vmatpush3.bf16.msra.mxu0 %v3137_v8  ;;  %2748 = vmatprep.mubr.msk.bf16.mxu0 %vm3047_vm0, %v3045_v5 }
 0x31e   :  { %2742 = vmatprep.subr.bf16.mxu0 %v3045_v5 }
 0x321   :  { %2743 = vmatpush3.bf16.msra.mxu0 %v3148_v10 }
 0x322   :  { %2744 = vmatprep.subr.bf16.mxu0 %v3045_v5 }
 0x325   :  { %2745 = vmatpush3.bf16.msra.mxu0 %v3170_v14 }
 0x326   :  { %2746 = vmatprep.subr.bf16.mxu0 %v3045_v5 }
 0x329   :  { %2747 = vmatpush3.bf16.msra.mxu0 %v3191_v18 }
 0x32a   :  { %2764 = vmatprep.subr.bf16.mxu0 %v3045_v5 }
 0x3dc   :  { %v567_v56 = vpop.f32.mrf.mxu0 }
 0x3dd   :  { %v568_v57 = vadd.f32 %v567_v56, %v523_v55 }
 0x3de   :  { %v2738_v58 = vpop.f32.mrf.mxu0 }
 0x3df   :  { %v574_v59 = vmax.f32 %v568_v57, 0.0  ;;  %v931_v57 = vpop.permute.xlu0 %930 }
 0x3e0   :  { %v570_v60 = vpop.f32.mrf.mxu0 }
 0x3e1   :  { %v576_v61 = vadd.f32 %v574_v59, %v3237_v36  ;;  %v571_v62 = vadd.f32 %v570_v60, %v3292_v48 }
 0x3e2   :  { %v2739_v0 = vpop.f32.mrf.mxu0 }
 0x3e3   :  { %v575_v1 = vmax.f32 %v571_v62, 0.0  ;;  %v591_v2 = vmul.f32 %v584_v63, %v576_v61 }
 0x3e5   :  { %v577_v3 = vadd.f32 %v575_v1, %v3234_v35  ;;  %v606_v7 = vadd.f32 %v599_v6, %v591_v2  ;;  %v1113_v1 = vld [vmem:[%s3732_s8 + $0x8] sm:$0xff]  ;;  %v1114_v2 = vld [vmem:[%s3732_s8 + $0x10] sm:$0xff] }
 0x3e6   :  { %v2432_v6 = vld [vmem:[%s3732_s8 + $0x30] sm:$0xff] }
 0x3e7   :  { %v592_v4 = vmul.f32 %v3294_v49, %v577_v3  ;;  %v2430_v3 = vld [vmem:[%s3732_s8 + $0x20] sm:$0xff] }
 0x3e9   :  { %v607_v12 = vadd.f32 %v3296_v50, %v592_v4  ;;  %v2431_v4 = vld [vmem:[%s3732_s8 + $0x28] sm:$0xff] }
 0x3eb   :  { %v611_v13 = vpack.c.bf16 %v607_v12, %v606_v7  ;;  %v2433_v7 = vld [vmem:[%s3732_s8 + $0x38] sm:$0xff] }
 0x3ed   :  { %2749 = vmatmul.mubr.msk.bf16.vlgmr.msra.gmra.mxu0 %vm152_vm2, %v611_v13  ;;  %2761 = vmatmul.mubr.msk.bf16.vlgmr.msra.gmra.mxu1 %vm152_vm2, %v611_v13 }
 0x3ee   :  { %2765 = vmatpush3.bf16.msra.mxu0 %v3250_v42  ;;  %2772 = vmatprep.mubr.msk.bf16.mxu0 %vm3047_vm0, %v3045_v5 }
 0x3ef   :  { %2766 = vmatprep.subr.bf16.mxu0 %v3045_v5  ;;  %2782 = vmatprep.mubr.msk.bf16.mxu1 %vm3047_vm0, %v3045_v5 }
 0x3f2   :  { %2767 = vmatpush3.bf16.msra.mxu0 %v3258_v44 }
 0x3f3   :  { %2768 = vmatprep.subr.bf16.mxu0 %v3045_v5 }
 0x3f6   :  { %2769 = vmatpush3.bf16.msra.mxu0 %v3269_v45 }
 0x3f7   :  { %2770 = vmatprep.subr.bf16.mxu0 %v3045_v5 }
 0x3fa   :  { %2771 = vmatpush3.bf16.msra.mxu0 %v3276_v46 }
 0x3fb   :  { %2798 = vmatprep.subr.bf16.mxu0 %v3045_v5 }
 0x3fd   :  { %2773 = vmatmul.mubr.msk.bf16.vlgmr.msra.gmra.mxu0 %vm152_vm2, %v611_v13 }
 0x3fe   :  { %2799 = vmatpush3.bf16.msra.mxu0 %v3142_v9  ;;  %2806 = vmatprep.mubr.msk.bf16.mxu0 %vm3047_vm0, %v3045_v5 }
 0x3ff   :  { %2800 = vmatprep.subr.bf16.mxu0 %v3045_v5 }
 0x402   :  { %2801 = vmatpush3.bf16.msra.mxu0 %v3155_v11 }
 0x403   :  { %2802 = vmatprep.subr.bf16.mxu0 %v3045_v5 }
 0x406   :  { %2803 = vmatpush3.bf16.msra.mxu0 %v3182_v16 }
 0x407   :  { %2804 = vmatprep.subr.bf16.mxu0 %v3045_v5 }
 0x40a   :  { %2805 = vmatpush3.bf16.msra.mxu0 %v3197_v19  ;;  %v2356_v19 = vld [vmem:[%s3725_s1 + $0x20] sm:$0xff] }
 0x40b   :  { %2822 = vmatprep.subr.bf16.mxu0 %v3045_v5  ;;  %v66_v27 = vpack.c.bf16 %v2357_v25, %v2356_v19  ;;  %v3510_v19 = vld [vmem:[%s3734_s10 + $0x18] sm:$0xff]  }
 0x40c   :  { %v2467_v25 = vld [vmem:[%s3732_s8 + $0x58] sm:$0xff] }
 0x4ad   :  { %v649_v36 = vpop.f32.mrf.mxu0  ;;  %v690_v48 = vpop.f32.mrf.mxu1 }
 0x4af   :  { %v2750_v9 = vpop.f32.mrf.mxu0  ;;  %v2762_v49 = vpop.f32.mrf.mxu1 }
 0x4b0   :  { %v2435_v49 = vld [vmem:[%s3732_s8 + $0x88] sm:$0xff] }
 0x4b1   :  { %v652_v50 = vpop.f32.mrf.mxu0  ;;  %v693_v15 = vpop.f32.mrf.mxu1 }
 0x4b2   :  { %v739_v16 = vpack.c.bf16 %v693_v15, %v690_v48  ;;  %v738_v26 = vpack.c.bf16 %v652_v50, %v649_v36  ;;  %v2436_v50 = vld [vmem:[%s3732_s8 + $0x90] sm:$0xff]  ;;  %v2437_v15 = vld [vmem:[%s3732_s8 + $0x98] sm:$0xff] }
 0x4b3   :  { %v2751_v17 = vpop.f32.mrf.mxu0  ;;  %v2763_v20 = vpop.f32.mrf.mxu1 }
 0x4b4   :  { %v2452_v17 = vld [vmem:[%s3732_s8 + $0xa0] sm:$0xff]  ;;  %v2453_v20 = vld [vmem:[%s3732_s8 + $0xa8] sm:$0xff] }
 0x4bd   :  { %v731_v21 = vpop.f32.mrf.mxu0 }
 0x4bf   :  { %v2774_v11 = vpop.f32.mrf.mxu0 }
 0x4c0   :  { %v2455_v11 = vld [vmem:[%s3732_s8 + $0xb8] sm:$0xff] }
 0x4c1   :  { %v734_v22 = vpop.f32.mrf.mxu0 }
 0x4c2   :  { %v740_v23 = vpack.c.bf16 %v734_v22, %v731_v21  ;;  %v2454_v21 = vld [vmem:[%s3732_s8 + $0xb0] sm:$0xff]  ;;  %v2464_v22 = vld [vmem:[%s3732_s8 + $0x40] sm:$0xff] }
 0x4c3   :  { %v2775_v24 = vpop.f32.mrf.mxu0 }
 0x4c4   :  { %2777 = vmatpush3.bf16.msra.mxu1 %v740_v23  ;;  %v3490_v23 = vld [vmem:[%s3734_s10 + $0x8] sm:$0xff]  }
 0x4c5   :  { %2778 = vmatprep.subr.bf16.mxu1 %v3045_v5  ;;  %v2465_v24 = vld [vmem:[%s3732_s8 + $0x48] sm:$0xff] }
 0x4c8   :  { %2779 = vmatpush3.bf16.msra.mxu1 %v739_v16  ;;  %v2466_v16 = vld [vmem:[%s3732_s8 + $0x50] sm:$0xff] }
 0x4c9   :  { %2780 = vmatprep.subr.bf16.mxu1 %v3045_v5 }
 0x4cc   :  { %2781 = vmatpush3.bf16.msra.mxu1 %v738_v26  ;;  %v2468_v26 = vld [vmem:[%s3732_s8 + $0x60] sm:$0xff] }
 0x4cd   :  { %2786 = vmatprep.subr.bf16.mxu1 %v3045_v5 }
 0x4cf   :  { %2783 = vmatmul.mubr.msk.bf16.vlgmr.msra.gmra.mxu1 %vm340_vm3, %v66_v27  ;;  %v2470_v27 = vld [vmem:[%s3732_s8 + $0x70] sm:$0xff] }
 0x4d0   :  { %2787 = vmatpush3.bf16.msra.mxu1 %v3137_v8  ;;  %2794 = vmatprep.mubr.msk.bf16.mxu1 %vm3047_vm0, %v3045_v5 }
 0x4d1   :  { %2788 = vmatprep.subr.bf16.mxu1 %v3045_v5 }
 0x4d4   :  { %2789 = vmatpush3.bf16.msra.mxu1 %v3148_v10 }
 0x4d5   :  { %2790 = vmatprep.subr.bf16.mxu1 %v3045_v5 }
 0x4d8   :  { %2791 = vmatpush3.bf16.msra.mxu1 %v3170_v14 }
 0x4d9   :  { %2792 = vmatprep.subr.bf16.mxu1 %v3045_v5 }
 0x4dc   :  { %2793 = vmatpush3.bf16.msra.mxu1 %v3191_v18 }
 0x4dd   :  { %2810 = vmatprep.subr.bf16.mxu1 %v3045_v5 }
 0x58f   :  { %v788_v28 = vpop.f32.mrf.mxu1 }
 0x590   :  { %v789_v30 = vadd.f32 %v788_v28, %v744_v29  ;;  %v2472_v28 = vld [vmem:[%s3732_s8 + $0xc0] sm:$0xff]  ;;  %v2474_v29 = vld [vmem:[%s3732_s8 + $0xd0] sm:$0xff] }
 0x591   :  { %v2784_v8 = vpop.f32.mrf.mxu1 }
 0x592   :  { %v795_v34 = vmax.f32 %v789_v30, 0.0  ;;  %v2003_v8 = vld [vmem:[%s3733_s9] sm:$0xff]  ;;  %v2005_v30 = vld [vmem:[%s3733_s9 + $0x10] sm:$0xff] }
 0x593   :  { %v791_v31 = vpop.f32.mrf.mxu1 }
 0x594   :  { %v792_v32 = vadd.f32 %v791_v31, %v3298_v51  ;;  %v2434_v31 = vld [vmem:[%s3732_s8 + $0x80] sm:$0xff] }
 0x595   :  { %v2785_v33 = vpop.f32.mrf.mxu1 }
 0x596   :  { %v796_v10 = vmax.f32 %v792_v32, 0.0  ;;  %v2469_v32 = vld [vmem:[%s3732_s8 + $0x68] sm:$0xff]  ;;  %v2471_v33 = vld [vmem:[%s3732_s8 + $0x78] sm:$0xff] }
 0x598   :  { %v798_v37 = vpack.c.bf16 %v796_v10, %v795_v34  ;;  %v2473_v10 = vld [vmem:[%s3732_s8 + $0xc8] sm:$0xff] }
 0x59a   :  { %2795 = vmatmul.mubr.msk.bf16.vlgmr.msra.gmra.mxu1 %vm152_vm2, %v798_v37  ;;  %2807 = vmatmul.mubr.msk.bf16.vlgmr.msra.gmra.mxu0 %vm152_vm2, %v798_v37 }
 0x59b   :  { %2811 = vmatpush3.bf16.msra.mxu1 %v3250_v42  ;;  %2818 = vmatprep.mubr.msk.bf16.mxu1 %vm3047_vm0, %v3045_v5 }
 0x59c   :  { %2812 = vmatprep.subr.bf16.mxu1 %v3045_v5  ;;  %2828 = vmatprep.mubr.msk.bf16.mxu0 %vm3047_vm0, %v3045_v5 }
 0x59f   :  { %2813 = vmatpush3.bf16.msra.mxu1 %v3258_v44 }
 0x5a0   :  { %2814 = vmatprep.subr.bf16.mxu1 %v3045_v5 }
 0x5a3   :  { %2815 = vmatpush3.bf16.msra.mxu1 %v3269_v45 }
 0x5a4   :  { %2816 = vmatprep.subr.bf16.mxu1 %v3045_v5 }
 0x5a7   :  { %2817 = vmatpush3.bf16.msra.mxu1 %v3276_v46  ;;  %v67_v46 = vld [vmem:[%s3726_s2] sm:$0xff] }
 0x5a8   :  { %v68_v56 = vpack.c.bf16 %v67_v46, %v67_v46 }
 0x5aa   :  { %2819 = vmatmul.mubr.msk.bf16.vlgmr.msra.gmra.mxu1 %vm152_vm2, %v798_v37  ;;  %v2475_v37 = vld [vmem:[%s3732_s8 + $0xd8] sm:$0xff] }
 0x65a   :  { %v836_v14 = vpop.f32.mrf.mxu1  ;;  %v877_v18 = vpop.f32.mrf.mxu0 }
 0x65c   :  { %v2796_v42 = vpop.f32.mrf.mxu1  ;;  %v2808_v51 = vpop.f32.mrf.mxu0 }
 0x65d   :  { %v2006_v51 = vld [vmem:[%s3733_s9 + $0x18] sm:$0xff] }
 0x65e   :  { %v839_v38 = vpop.f32.mrf.mxu1  ;;  %v880_v40 = vpop.f32.mrf.mxu0 }
 0x65f   :  { %v926_v45 = vpack.c.bf16 %v880_v40, %v877_v18  ;;  %v925_v55 = vpack.c.bf16 %v839_v38, %v836_v14  ;;  %v2004_v18 = vld [vmem:[%s3733_s9 + $0x8] sm:$0xff] }
 0x660   :  { %v2797_v41 = vpop.f32.mrf.mxu1  ;;  %v2809_v43 = vpop.f32.mrf.mxu0 }
 0x66a   :  { %v918_v47 = vpop.f32.mrf.mxu1 }
 0x66c   :  { %v2820_v44 = vpop.f32.mrf.mxu1 }
 0x66e   :  { %v921_v52 = vpop.f32.mrf.mxu1 }
 0x66f   :  { %v927_v53 = vpack.c.bf16 %v921_v52, %v918_v47 }
 0x670   :  { %v2821_v54 = vpop.f32.mrf.mxu1 }
 0x671   :  { %2823 = vmatpush3.bf16.msra.mxu0 %v927_v53 }
 0x672   :  { %2824 = vmatprep.subr.bf16.mxu0 %v3045_v5 }
 0x675   :  { %2825 = vmatpush3.bf16.msra.mxu0 %v926_v45 }
 0x676   :  { %2826 = vmatprep.subr.bf16.mxu0 %v3045_v5  ;;  %v1112_v5 = vld [vmem:[%s3732_s8] sm:$0xff] }
 0x679   :  { %2827 = vmatpush3.bf16.msra.mxu0 %v925_v55 }
 0x67a   :  { %2832 = vmatprep.subr.bf16.mxu0 %v3490_v23 }
 0x67c   :  { %2829 = vmatmul.mubr.msk.bf16.vlgmr.msra.gmra.mxu0 %vm340_vm3, %v68_v56 }
 0x67d   :  { %2833 = vmatpush3.bf16.msra.mxu0 %v3490_v23 }
 0x73c   :  { %v970_v58 = vpop.f32.mrf.mxu0 }
 0x73d   :  { %v971_v59 = vadd.f32 %v970_v58, %v931_v57 }
 0x73e   :  { %v2830_v60 = vpop.f32.mrf.mxu0 }
 0x73f   :  { %v976_v61 = vmax.f32 %v971_v59, 0.0 }
 0x740   :  { %v973_v62 = vpop.f32.mrf.mxu0 }
 0x741   :  { %v978_v63 = vadd.f32 %v976_v61, %v3234_v35  ;;  %v1115_v35 = vld [vmem:[%s3732_s8 + $0x18] sm:$0xff] }
 0x742   :  { %v2831_v0 = vpop.f32.mrf.mxu0 }
 0x743   :  { %1015 = vrot.lane.b32.xlu0 %v978_v63, %s3048_s3 }
 0x747   :  { %1118 = vperm.xlu0 %3002, %v1112_v5  }
 0x74b   :  { %1123 = vperm.xlu0 %3002, %v1113_v1  }
 0x74f   :  { %1128 = vperm.xlu0 %3002, %v1114_v2  }
 0x753   :  { %1133 = vperm.xlu0 %3002, %v1115_v35  }
 0x757   :  { %1147 = vperm.xlu0 %3002, %v2430_v3  }
 0x75b   :  { %1152 = vperm.xlu0 %3002, %v2431_v4  }
 0x75f   :  { %1157 = vperm.xlu0 %3002, %v2432_v6   ;;  %v3575_v6 = vld [vmem:[%s3734_s10 + $0x10] sm:$0xff]  }
 0x763   :  { %1162 = vperm.xlu0 %3002, %v2433_v7   ;;  %v3584_v7 = vld [vmem:[%s3734_s10 + $0x28] sm:$0xff]  }
 0x7b5   :  { %v1016_v12 = vpop.permute.xlu0 %1015 }
 0x7b6   :  { %1020 = vxpose.xlu1.b32.end [2/2] (short) (narrow) %v1016_v12, 32  ;;  %v3591_v12 = vld [vmem:[%s3734_s10 + $0x20] sm:$0xff]  }
 0x7c2   :  { %v1119_v34 = vpop.permute.xlu0 %1118 }
 0x7c6   :  { %v1124_v14 = vpop.permute.xlu0 %1123 }
 0x7ca   :  { %v1129_v42 = vpop.permute.xlu0 %1128 }
 0x7ce   :  { %v1134_v38 = vpop.permute.xlu0 %1133 }
 0x7d2   :  { %v1148_v40 = vpop.permute.xlu0 %1147 }
 0x7d6   :  { %v1153_v41 = vpop.permute.xlu0 %1152 }
 0x7da   :  { %v1158_v43 = vpop.permute.xlu0 %1157 }
 0x7de   :  { %v1163_v47 = vpop.permute.xlu0 %1162 }
 0x82e   :  { %v1035_v13 = vpop.trf.xlu1 }
 0x82f   :  { %1055 = vrot.lane.b32.xlu0 %v1035_v13, %s3049_s25  ;;  %v1072_v13 = vld [vmem:[%s3730_s6] sm:$0xff] }
 0x832   :  { %v1036_v36 = vpop.trf.xlu1 }
 0x833   :  { %1057 = vrot.lane.b32.xlu0 %v1036_v36, %s3049_s25  ;;  %v1073_v36 = vld [vmem:[%s3730_s6 + $0x8] sm:$0xff] }
 0x836   :  { %v1037_v48 = vpop.trf.xlu1 }
 0x837   :  { %1059 = vrot.lane.b32.xlu0 %v1037_v48, %s3049_s25  ;;  %v1076_v48 = vpack.c.bf16 %v1073_v36, %v1072_v13 }
 0x839   :  { %2868 = vmatprep.mubr.msk.bf16.mxu1 %vm1391_vm5, %v1076_v48 }
 0x83a   :  { %v1038_v9 = vpop.trf.xlu1 }
 0x83b   :  { %1061 = vrot.lane.b32.xlu1 %v1038_v9, %s3049_s25 }
 0x83f   :  { %1378 = vperm.xlu1 %3003, %v2435_v49  }
 0x843   :  { %1383 = vperm.xlu1 %3003, %v2436_v50  }
 0x847   :  { %1388 = vperm.xlu1 %3003, %v2437_v15  }
 0x84b   :  { %1619 = vperm.xlu1 %3003, %v2452_v17  }
 0x84f   :  { %1624 = vperm.xlu1 %3003, %v2453_v20  }
 0x853   :  { %1629 = vperm.xlu1 %3003, %v2454_v21  }
 0x855   :  { %979 = vxpose.xlu0.b32.start [1/2] (short) (narrow) %v3243_v39, 32  ;;  %v3500_v39 = vld [vmem:[%s3734_s10] sm:$0xff]  }
 0x856   :  { %2834 = vmatprep.subr.bf16.mxu0 %v3500_v39 }
 0x857   :  { %1634 = vperm.xlu1 %3003, %v2455_v11   ;;  %2835 = vmatpush3.bf16.msra.mxu0 %v3500_v39 }
 0x858   :  { %2840 = vmatprep.subr.bf16.mxu0 %v3510_v19 }
 0x859   :  { %980 = vxpose.xlu0.b32.end [2/2] (short) (narrow) %v978_v63, 32 }
 0x85b   :  { %1707 = vperm.xlu1 %3003, %v2464_v22  }
 0x85f   :  { %1712 = vperm.xlu1 %3003, %v2465_v24  }
 0x863   :  { %1717 = vperm.xlu1 %3003, %v2466_v16  }
 0x867   :  { %1722 = vperm.xlu1 %3003, %v2467_v25  }
 0x86b   :  { %1736 = vperm.xlu1 %3003, %v2468_v26  }
 0x86f   :  { %1746 = vperm.xlu1 %3003, %v2470_v27  }
 0x873   :  { %1926 = vperm.xlu1 %3003, %v2472_v28  }
 0x877   :  { %1936 = vperm.xlu1 %3003, %v2474_v29  }
 0x87b   :  { %2170 = vperm.xlu1 %3003, %v2003_v8  }
 0x87f   :  { %2180 = vperm.xlu1 %3003, %v2005_v30  }
 0x88a   :  { %1373 = vperm.xlu0 %3002, %v2434_v31   ;;  %v1074_v31 = vld [vmem:[%s3730_s6 + $0x10] sm:$0xff] }
 0x88e   :  { %1741 = vperm.xlu0 %3002, %v2469_v32   ;;  %v1075_v32 = vld [vmem:[%s3730_s6 + $0x18] sm:$0xff] }
 0x892   :  { %1751 = vperm.xlu0 %3002, %v2471_v33   ;;  %v1077_v33 = vpack.c.bf16 %v1075_v32, %v1074_v31 }
 0x896   :  { %1931 = vperm.xlu0 %3002, %v2473_v10  }
 0x89a   :  { %1941 = vperm.xlu0 %3002, %v2475_v37  }
 0x89e   :  { %2175 = vperm.xlu0 %3002, %v2004_v18  }
 0x8a1   :  { %v1056_v44 = vpop.permute.xlu0 %1055 }
 0x8a2   :  { %2185 = vperm.xlu0 %3002, %v2006_v51  }
 0x8a5   :  { %v1058_v52 = vpop.permute.xlu0 %1057 }
 0x8a9   :  { %v1060_v53 = vpop.permute.xlu0 %1059 }
 0x8ad   :  { %v1062_v63 = vpop.permute.xlu1 %1061 }
 0x8d1   :  { %v995_v54 = vpop.trf.xlu0 }
 0x8d2   :  { %v3556_v45 = vsel %vm1067_vm4, %v995_v54, %v1056_v44 }
 0x8d3   :  { %v1136_v46 = vmul.f32 %v1119_v34, %v3556_v45  ;;  %v1379_v34 = vpop.permute.xlu1 %1378 }
 0x8d5   :  { %v996_v55 = vpop.trf.xlu0  ;;  %v1165_v58 = vadd.f32 %v1148_v40, %v1136_v46 }
 0x8d6   :  { %v3560_v56 = vsel %vm1067_vm4, %v996_v55, %v1058_v52 }
 0x8d7   :  { %v1137_v57 = vmul.f32 %v1124_v14, %v3560_v56  ;;  %v1384_v10 = vpop.permute.xlu1 %1383 }
 0x8d9   :  { %v1166_v59 = vadd.f32 %v1153_v41, %v1137_v57  ;;  %v997_v60 = vpop.trf.xlu0  ;;  %v2414_v57 = vld [vmem:[%s3730_s6 + $0x20] sm:$0xff] }
 0x8da   :  { %v3564_v61 = vsel %vm1067_vm4, %v997_v60, %v1060_v53 }
 0x8db   :  { %v1174_v62 = vpack.c.bf16 %v1166_v59, %v1165_v58  ;;  %v1138_v0 = vmul.f32 %v1129_v42, %v3564_v61  ;;  %v1389_v18 = vpop.permute.xlu1 %1388  ;;  %v2415_v58 = vld [vmem:[%s3730_s6 + $0x28] sm:$0xff] }
 0x8dc   :  { %v1083_v59 = vpack.c.bf16 %v2415_v58, %v2414_v57 }
 0x8dd   :  { %2836 = vmatprep.mubr.msk.bf16.mxu0 %vm53_vm1, %v1174_v62  ;;  %v998_v5 = vpop.trf.xlu0  ;;  %v1167_v35 = vadd.f32 %v1158_v43, %v1138_v0 }
 0x8de   :  { %v3569_v1 = vsel %vm1067_vm4, %v998_v5, %v1062_v63 }
 0x8df   :  { %v1139_v2 = vmul.f32 %v1134_v38, %v3569_v1 }
 0x8e1   :  { %v1168_v3 = vadd.f32 %v1163_v47, %v1139_v2 }
 0x8e3   :  { %v1175_v4 = vpack.c.bf16 %v1168_v3, %v1167_v35 }
 0x8e5   :  { %2837 = vmatmul.mubr.msk.bf16.vlgmr.msra.gmra.mxu0 %vm53_vm1, %v1175_v4 }
 0x8e6   :  { %2841 = vmatpush3.bf16.msra.mxu0 %v3510_v19  ;;  %2844 = vmatprep.mubr.msk.bf16.mxu0 %vm53_vm1, %v1174_v62 }
 0x8e7   :  { %2842 = vmatprep.subr.bf16.mxu0 %v3575_v6 }
 0x8ea   :  { %2843 = vmatpush3.bf16.msra.mxu0 %v3575_v6 }
 0x8eb   :  { %2848 = vmatprep.subr.bf16.mxu0 %v3584_v7 }
 0x8ed   :  { %2845 = vmatmul.mubr.msk.bf16.vlgmr.msra.gmra.mxu0 %vm53_vm1, %v1175_v4 }
 0x8ee   :  { %2849 = vmatpush3.bf16.msra.mxu0 %v3584_v7  ;;  %2852 = vmatprep.mubr.msk.bf16.mxu0 %vm53_vm1, %v1174_v62 }
 0x8ef   :  { %2850 = vmatprep.subr.bf16.mxu0 %v3591_v12 }
 0x8f2   :  { %2851 = vmatpush3.bf16.msra.mxu0 %v3591_v12 }
 0x8f3   :  { %2872 = vmatprep.subr.bf16.mxu0 %v3490_v23 }
 0x8f5   :  { %2853 = vmatmul.mubr.msk.bf16.vlgmr.msra.gmra.mxu0 %vm53_vm1, %v1175_v4 }
 0x8f6   :  { %2873 = vmatpush3.bf16.msra.mxu0 %v3490_v23 }
 0x8f7   :  { %2874 = vmatprep.subr.bf16.mxu0 %v3500_v39 }
 0x8fa   :  { %2875 = vmatpush3.bf16.msra.mxu0 %v3500_v39 }
 0x8fb   :  { %2880 = vmatprep.subr.bf16.mxu0 %v3510_v19 }
 0x905   :  { %v1374_v42 = vpop.permute.xlu0 %1373 }
 0x9a5   :  { %v2838_v9 = vpop.f32.mrf.mxu0 }
 0x9a7   :  { %v1228_v49 = vpop.f32.mrf.mxu0 }
 0x9a9   :  { %v2839_v50 = vpop.f32.mrf.mxu0 }
 0x9aa   :  { %v1366_v8 = vpack.c.bf16 %v2839_v50, %v2838_v9 }
 0x9ab   :  { %v1231_v15 = vpop.f32.mrf.mxu0 }
 0x9ac   :  { %v1365_v30 = vpack.c.bf16 %v1231_v15, %v1228_v49 }
 0x9ad   :  { %v2846_v17 = vpop.f32.mrf.mxu0 }
 0x9af   :  { %v1289_v20 = vpop.f32.mrf.mxu0 }
 0x9b1   :  { %v2847_v21 = vpop.f32.mrf.mxu0 }
 0x9b2   :  { %v1368_v28 = vpack.c.bf16 %v2847_v21, %v2846_v17  ;;  %v2416_v21 = vld [vmem:[%s3730_s6 + $0x30] sm:$0xff] }
 0x9b3   :  { %v1292_v11 = vpop.f32.mrf.mxu0 }
 0x9b4   :  { %v1367_v29 = vpack.c.bf16 %v1292_v11, %v1289_v20  ;;  %v2417_v11 = vld [vmem:[%s3730_s6 + $0x38] sm:$0xff] }
 0x9b5   :  { %v2854_v22 = vpop.f32.mrf.mxu0 }
 0x9b7   :  { %v1350_v24 = vpop.f32.mrf.mxu0 }
 0x9b9   :  { %v2855_v16 = vpop.f32.mrf.mxu0 }
 0x9ba   :  { %v1370_v25 = vpack.c.bf16 %v2855_v16, %v2854_v22  ;;  %v1084_v22 = vpack.c.bf16 %v2417_v11, %v2416_v21 }
 0x9bb   :  { %v1353_v26 = vpop.f32.mrf.mxu0 }
 0x9bc   :  { %v1369_v27 = vpack.c.bf16 %v1353_v26, %v1350_v24  ;;  %2856 = vmatprep.subr.bf16.mxu1 %v1370_v25  ;;  %v1620_v24 = vpop.permute.xlu1 %1619 }
 0x9bd   :  { %2857 = vmatpush3.bf16.msra.mxu1 %v1370_v25 }
 0x9be   :  { %2858 = vmatprep.subr.bf16.mxu1 %v1369_v27 }
 0x9c0   :  { %v1625_v16 = vpop.permute.xlu1 %1624 }
 0x9c1   :  { %2859 = vmatpush3.bf16.msra.mxu1 %v1369_v27 }
 0x9c2   :  { %2860 = vmatprep.subr.bf16.mxu1 %v1368_v28 }
 0x9c4   :  { %v1630_v25 = vpop.permute.xlu1 %1629 }
 0x9c5   :  { %2861 = vmatpush3.bf16.msra.mxu1 %v1368_v28 }
 0x9c6   :  { %2862 = vmatprep.subr.bf16.mxu1 %v1367_v29 }
 0x9c8   :  { %v1635_v26 = vpop.permute.xlu1 %1634 }
 0x9c9   :  { %2863 = vmatpush3.bf16.msra.mxu1 %v1367_v29 }
 0x9ca   :  { %2864 = vmatprep.subr.bf16.mxu1 %v1366_v8 }
 0x9cc   :  { %v1708_v27 = vpop.permute.xlu1 %1707 }
 0x9cd   :  { %2865 = vmatpush3.bf16.msra.mxu1 %v1366_v8 }
 0x9ce   :  { %2866 = vmatprep.subr.bf16.mxu1 %v1365_v30 }
 0x9d0   :  { %v1713_v28 = vpop.permute.xlu1 %1712 }
 0x9d1   :  { %2867 = vmatpush3.bf16.msra.mxu1 %v1365_v30 }
 0x9d4   :  { %2869 = vmatmul.mubr.msk.bf16.vlgmr.msra.gmra.mxu1 %vm1391_vm5, %v1077_v33  ;;  %v1718_v29 = vpop.permute.xlu1 %1717 }
 0x9d5   :  { %2908 = vmatprep.mubr.msk.bf16.mxu1 %vm1391_vm5, %v1083_v59 }
 0x9d8   :  { %v1723_v32 = vpop.permute.xlu1 %1722 }
 0xa94   :  { %v2870_v37 = vpop.f32.mrf.mxu1 }
 0xa95   :  { %v1441_v41 = vadd.f32 %v2870_v37, %v1384_v10 }
 0xa96   :  { %v1432_v14 = vpop.f32.mrf.mxu1 }
 0xa97   :  { %v1433_v38 = vadd.f32 %v1432_v14, %v1374_v42  ;;  %v1449_v54 = vmax.f32 %v1441_v41, 0.0  ;;  %v1742_v42 = vpop.permute.xlu0 %1741 }
 0xa98   :  { %v2871_v51 = vpop.f32.mrf.mxu1 }
 0xa99   :  { %v1444_v40 = vadd.f32 %v2871_v51, %v1389_v18  ;;  %v1447_v52 = vmax.f32 %v1433_v38, 0.0 }
 0xa9a   :  { %v1435_v43 = vpop.f32.mrf.mxu1 }
 0xa9b   :  { %v1436_v47 = vadd.f32 %v1435_v43, %v1379_v34  ;;  %v1450_v44 = vmax.f32 %v1444_v40, 0.0  ;;  %v1737_v43 = vpop.permute.xlu1 %1736 }
 0xa9d   :  { %v1448_v53 = vmax.f32 %v1436_v47, 0.0  ;;  %v1457_v55 = vpack.c.bf16 %v1450_v44, %v1449_v54 }
 0xa9f   :  { %v1456_v46 = vpack.c.bf16 %v1448_v53, %v1447_v52  ;;  %v1747_v59 = vpop.permute.xlu1 %1746 }
 0xaa1   :  { %2876 = vmatprep.mubr.msk.bf16.mxu0 %vm53_vm1, %v1456_v46 }
 0xaa2   :  { %2877 = vmatmul.mubr.msk.bf16.vlgmr.msra.gmra.mxu0 %vm53_vm1, %v1457_v55 }
 0xaa3   :  { %2881 = vmatpush3.bf16.msra.mxu0 %v3510_v19  ;;  %2884 = vmatprep.mubr.msk.bf16.mxu0 %vm53_vm1, %v1456_v46 }
 0xaa4   :  { %2882 = vmatprep.subr.bf16.mxu0 %v3575_v6 }
 0xaa7   :  { %2883 = vmatpush3.bf16.msra.mxu0 %v3575_v6 }
 0xaa8   :  { %2888 = vmatprep.subr.bf16.mxu0 %v3584_v7 }
 0xaaa   :  { %2885 = vmatmul.mubr.msk.bf16.vlgmr.msra.gmra.mxu0 %vm53_vm1, %v1457_v55 }
 0xaab   :  { %2889 = vmatpush3.bf16.msra.mxu0 %v3584_v7  ;;  %2892 = vmatprep.mubr.msk.bf16.mxu0 %vm53_vm1, %v1456_v46 }
 0xaac   :  { %2890 = vmatprep.subr.bf16.mxu0 %v3591_v12 }
 0xaaf   :  { %2891 = vmatpush3.bf16.msra.mxu0 %v3591_v12 }
 0xab0   :  { %2912 = vmatprep.subr.bf16.mxu0 %v3490_v23 }
 0xab2   :  { %2893 = vmatmul.mubr.msk.bf16.vlgmr.msra.gmra.mxu0 %vm53_vm1, %v1457_v55  ;;  %v1752_v55 = vpop.permute.xlu0 %1751 }
 0xab3   :  { %2913 = vmatpush3.bf16.msra.mxu0 %v3490_v23 }
 0xab4   :  { %2914 = vmatprep.subr.bf16.mxu0 %v3500_v39 }
 0xab7   :  { %2915 = vmatpush3.bf16.msra.mxu0 %v3500_v39 }
 0xab8   :  { %2920 = vmatprep.subr.bf16.mxu0 %v3510_v19 }
 0xb62   :  { %v2878_v60 = vpop.f32.mrf.mxu0 }
 0xb64   :  { %v1498_v62 = vpop.f32.mrf.mxu0 }
 0xb66   :  { %v2879_v63 = vpop.f32.mrf.mxu0 }
 0xb67   :  { %v1612_v17 = vpack.c.bf16 %v2879_v63, %v2878_v60 }
 0xb68   :  { %v1501_v0 = vpop.f32.mrf.mxu0 }
 0xb69   :  { %v1611_v20 = vpack.c.bf16 %v1501_v0, %v1498_v62 }
 0xb6a   :  { %v2886_v5 = vpop.f32.mrf.mxu0 }
 0xb6c   :  { %v1547_v2 = vpop.f32.mrf.mxu0 }
 0xb6e   :  { %v2887_v35 = vpop.f32.mrf.mxu0 }
 0xb6f   :  { %v1614_v50 = vpack.c.bf16 %v2887_v35, %v2886_v5  ;;  %v2419_v35 = vld [vmem:[%s3730_s6 + $0x48] sm:$0xff] }
 0xb70   :  { %v1550_v3 = vpop.f32.mrf.mxu0 }
 0xb71   :  { %v1613_v15 = vpack.c.bf16 %v1550_v3, %v1547_v2  ;;  %v2418_v2 = vld [vmem:[%s3730_s6 + $0x40] sm:$0xff] }
 0xb72   :  { %v2894_v4 = vpop.f32.mrf.mxu0  ;;  %v1090_v3 = vpack.c.bf16 %v2419_v35, %v2418_v2 }
 0xb74   :  { %v1596_v13 = vpop.f32.mrf.mxu0 }
 0xb76   :  { %v2895_v36 = vpop.f32.mrf.mxu0 }
 0xb77   :  { %v1616_v48 = vpack.c.bf16 %v2895_v36, %v2894_v4 }
 0xb78   :  { %v1599_v9 = vpop.f32.mrf.mxu0 }
 0xb79   :  { %v1615_v49 = vpack.c.bf16 %v1599_v9, %v1596_v13  ;;  %2896 = vmatprep.subr.bf16.mxu1 %v1616_v48 }
 0xb7a   :  { %2897 = vmatpush3.bf16.msra.mxu1 %v1616_v48 }
 0xb7b   :  { %2898 = vmatprep.subr.bf16.mxu1 %v1615_v49 }
 0xb7e   :  { %2899 = vmatpush3.bf16.msra.mxu1 %v1615_v49 }
 0xb7f   :  { %2900 = vmatprep.subr.bf16.mxu1 %v1614_v50 }
 0xb82   :  { %2901 = vmatpush3.bf16.msra.mxu1 %v1614_v50 }
 0xb83   :  { %2902 = vmatprep.subr.bf16.mxu1 %v1613_v15 }
 0xb86   :  { %2903 = vmatpush3.bf16.msra.mxu1 %v1613_v15 }
 0xb87   :  { %2904 = vmatprep.subr.bf16.mxu1 %v1612_v17 }
 0xb8a   :  { %2905 = vmatpush3.bf16.msra.mxu1 %v1612_v17 }
 0xb8b   :  { %2906 = vmatprep.subr.bf16.mxu1 %v1611_v20 }
 0xb8e   :  { %2907 = vmatpush3.bf16.msra.mxu1 %v1611_v20 }
 0xb91   :  { %2909 = vmatmul.mubr.msk.bf16.vlgmr.msra.gmra.mxu1 %vm1391_vm5, %v1084_v22 }
 0xb92   :  { %2948 = vmatprep.mubr.msk.bf16.mxu1 %vm1391_vm5, %v1090_v3 }
 0xc51   :  { %v2910_v8 = vpop.f32.mrf.mxu1 }
 0xc52   :  { %v1686_v30 = vadd.f32 %v2910_v8, %v1630_v25  ;;  %v1927_v8 = vpop.permute.xlu1 %1926 }
 0xc53   :  { %v1677_v31 = vpop.f32.mrf.mxu1 }
 0xc54   :  { %v1678_v33 = vadd.f32 %v1677_v31, %v1620_v24  ;;  %v1694_v34 = vmax.f32 %v1686_v30, 0.0 }
 0xc55   :  { %v2911_v10 = vpop.f32.mrf.mxu1 }
 0xc56   :  { %v1692_v37 = vmax.f32 %v1678_v33, 0.0  ;;  %v1689_v14 = vadd.f32 %v2911_v10, %v1635_v26  ;;  %v1698_v41 = vadd.f32 %v1694_v34, %v3564_v61  ;;  %v2420_v26 = vld [vmem:[%s3730_s6 + $0x50] sm:$0xff]  ;;  %v1937_v34 = vpop.permute.xlu1 %1936 }
 0xc57   :  { %v1680_v18 = vpop.f32.mrf.mxu1 }
 0xc58   :  { %v1696_v51 = vadd.f32 %v1692_v37, %v3556_v45  ;;  %v1695_v38 = vmax.f32 %v1689_v14, 0.0  ;;  %v1681_v40 = vadd.f32 %v1680_v18, %v1625_v16  ;;  %v1727_v46 = vmul.f32 %v1718_v29, %v1698_v41  ;;  %v1932_v29 = vpop.permute.xlu0 %1931 }
 0xc5a   :  { %v1699_v47 = vadd.f32 %v1695_v38, %v3569_v1  ;;  %v1693_v44 = vmax.f32 %v1681_v40, 0.0  ;;  %v1725_v52 = vmul.f32 %v1708_v27, %v1696_v51  ;;  %v1756_v63 = vadd.f32 %v1747_v59, %v1727_v46  ;;  %v2421_v27 = vld [vmem:[%s3730_s6 + $0x58] sm:$0xff] }
 0xc5c   :  { %v1728_v53 = vmul.f32 %v1723_v32, %v1699_v47  ;;  %v1697_v54 = vadd.f32 %v1693_v44, %v3560_v56  ;;  %v1754_v60 = vadd.f32 %v1737_v43, %v1725_v52  ;;  %v1942_v32 = vpop.permute.xlu0 %1941 }
 0xc5e   :  { %v1726_v57 = vmul.f32 %v1713_v28, %v1697_v54  ;;  %v1757_v58 = vadd.f32 %v1752_v55, %v1728_v53  ;;  %v1091_v28 = vpack.c.bf16 %v2421_v27, %v2420_v26 }
 0xc60   :  { %v1755_v62 = vadd.f32 %v1742_v42, %v1726_v57  ;;  %v1764_v5 = vpack.c.bf16 %v1757_v58, %v1756_v63 }
 0xc62   :  { %v1763_v0 = vpack.c.bf16 %v1755_v62, %v1754_v60 }
 0xc64   :  { %2916 = vmatprep.mubr.msk.bf16.mxu0 %vm53_vm1, %v1763_v0 }
 0xc65   :  { %2917 = vmatmul.mubr.msk.bf16.vlgmr.msra.gmra.mxu0 %vm53_vm1, %v1764_v5 }
 0xc66   :  { %2921 = vmatpush3.bf16.msra.mxu0 %v3510_v19  ;;  %2924 = vmatprep.mubr.msk.bf16.mxu0 %vm53_vm1, %v1763_v0 }
 0xc67   :  { %2922 = vmatprep.subr.bf16.mxu0 %v3575_v6 }
 0xc6a   :  { %2923 = vmatpush3.bf16.msra.mxu0 %v3575_v6 }
 0xc6b   :  { %2928 = vmatprep.subr.bf16.mxu0 %v3584_v7 }
 0xc6d   :  { %2925 = vmatmul.mubr.msk.bf16.vlgmr.msra.gmra.mxu0 %vm53_vm1, %v1764_v5 }
 0xc6e   :  { %2929 = vmatpush3.bf16.msra.mxu0 %v3584_v7  ;;  %2932 = vmatprep.mubr.msk.bf16.mxu0 %vm53_vm1, %v1763_v0 }
 0xc6f   :  { %2930 = vmatprep.subr.bf16.mxu0 %v3591_v12 }
 0xc72   :  { %2931 = vmatpush3.bf16.msra.mxu0 %v3591_v12 }
 0xc73   :  { %2952 = vmatprep.subr.bf16.mxu0 %v3490_v23 }
 0xc75   :  { %2933 = vmatmul.mubr.msk.bf16.vlgmr.msra.gmra.mxu0 %vm53_vm1, %v1764_v5 }
 0xc76   :  { %2953 = vmatpush3.bf16.msra.mxu0 %v3490_v23 }
 0xc77   :  { %2954 = vmatprep.subr.bf16.mxu0 %v3500_v39 }
 0xc7a   :  { %2955 = vmatpush3.bf16.msra.mxu0 %v3500_v39 }
 0xc7b   :  { %2960 = vmatprep.subr.bf16.mxu0 %v3510_v19 }
 0xd25   :  { %v2918_v4 = vpop.f32.mrf.mxu0 }
 0xd27   :  { %v1805_v13 = vpop.f32.mrf.mxu0 }
 0xd29   :  { %v2919_v23 = vpop.f32.mrf.mxu0 }
 0xd2a   :  { %v1919_v16 = vpack.c.bf16 %v2919_v23, %v2918_v4  ;;  %v1094_v4 = vld [vmem:[%s3731_s7 + $0x10] sm:$0xff] }
 0xd2b   :  { %v1808_v36 = vpop.f32.mrf.mxu0 }
 0xd2c   :  { %v1918_v25 = vpack.c.bf16 %v1808_v36, %v1805_v13  ;;  %v1095_v13 = vld [vmem:[%s3731_s7 + $0x18] sm:$0xff]  ;;  %v2171_v36 = vpop.permute.xlu1 %2170 }
 0xd2d   :  { %v2926_v48 = vpop.f32.mrf.mxu0  ;;  %v1097_v23 = vpack.c.bf16 %v1095_v13, %v1094_v4 }
 0xd2f   :  { %v1854_v9 = vpop.f32.mrf.mxu0 }
 0xd31   :  { %v2927_v39 = vpop.f32.mrf.mxu0 }
 0xd32   :  { %v1921_v22 = vpack.c.bf16 %v2927_v39, %v2926_v48  ;;  %v2176_v48 = vpop.permute.xlu0 %2175  ;;  %v2181_v39 = vpop.permute.xlu1 %2180 }
 0xd33   :  { %v1857_v49 = vpop.f32.mrf.mxu0 }
 0xd34   :  { %v1920_v24 = vpack.c.bf16 %v1857_v49, %v1854_v9 }
 0xd35   :  { %v2934_v50 = vpop.f32.mrf.mxu0 }
 0xd37   :  { %v1903_v15 = vpop.f32.mrf.mxu0 }
 0xd39   :  { %v2935_v17 = vpop.f32.mrf.mxu0 }
 0xd3a   :  { %v1923_v20 = vpack.c.bf16 %v2935_v17, %v2934_v50 }
 0xd3b   :  { %v1906_v21 = vpop.f32.mrf.mxu0 }
 0xd3c   :  { %v1922_v11 = vpack.c.bf16 %v1906_v21, %v1903_v15  ;;  %2936 = vmatprep.subr.bf16.mxu1 %v1923_v20  ;;  %v2186_v21 = vpop.permute.xlu0 %2185 }
 0xd3d   :  { %2937 = vmatpush3.bf16.msra.mxu1 %v1923_v20 }
 0xd3e   :  { %2938 = vmatprep.subr.bf16.mxu1 %v1922_v11 }
 0xd41   :  { %2939 = vmatpush3.bf16.msra.mxu1 %v1922_v11 }
 0xd42   :  { %2940 = vmatprep.subr.bf16.mxu1 %v1921_v22 }
 0xd45   :  { %2941 = vmatpush3.bf16.msra.mxu1 %v1921_v22 }
 0xd46   :  { %2942 = vmatprep.subr.bf16.mxu1 %v1920_v24 }
 0xd49   :  { %2943 = vmatpush3.bf16.msra.mxu1 %v1920_v24 }
 0xd4a   :  { %2944 = vmatprep.subr.bf16.mxu1 %v1919_v16 }
 0xd4d   :  { %2945 = vmatpush3.bf16.msra.mxu1 %v1919_v16 }
 0xd4e   :  { %2946 = vmatprep.subr.bf16.mxu1 %v1918_v25 }
 0xd51   :  { %2947 = vmatpush3.bf16.msra.mxu1 %v1918_v25 }
 0xd54   :  { %2949 = vmatmul.mubr.msk.bf16.vlgmr.msra.gmra.mxu1 %vm1391_vm5, %v1091_v28 }
 0xe14   :  { %v2950_v30 = vpop.f32.mrf.mxu1 }
 0xe15   :  { %v1993_v14 = vadd.f32 %v2950_v30, %v1937_v34 }
 0xe16   :  { %v1984_v31 = vpop.f32.mrf.mxu1 }
 0xe17   :  { %v1985_v10 = vadd.f32 %v1984_v31, %v1927_v8  ;;  %v2001_v41 = vmax.f32 %v1993_v14, 0.0 }
 0xe18   :  { %v2951_v33 = vpop.f32.mrf.mxu1 }
 0xe19   :  { %v1996_v37 = vadd.f32 %v2951_v33, %v1942_v32  ;;  %v1999_v38 = vmax.f32 %v1985_v10, 0.0 }
 0xe1a   :  { %v1987_v18 = vpop.f32.mrf.mxu1 }
 0xe1b   :  { %v1988_v42 = vadd.f32 %v1987_v18, %v1932_v29  ;;  %v2002_v51 = vmax.f32 %v1996_v37, 0.0 }
 0xe1d   :  { %v2000_v40 = vmax.f32 %v1988_v42, 0.0  ;;  %v2008_v47 = vpack.c.bf16 %v2002_v51, %v2001_v41 }
 0xe1f   :  { %v2007_v43 = vpack.c.bf16 %v2000_v40, %v1999_v38 }
 0xe21   :  { %2956 = vmatprep.mubr.msk.bf16.mxu0 %vm53_vm1, %v2007_v43 }
 0xe22   :  { %2957 = vmatmul.mubr.msk.bf16.vlgmr.msra.gmra.mxu0 %vm53_vm1, %v2008_v47 }
 0xe23   :  { %2961 = vmatpush3.bf16.msra.mxu0 %v3510_v19  ;;  %2964 = vmatprep.mubr.msk.bf16.mxu0 %vm53_vm1, %v2007_v43  ;;  %v1092_v19 = vld [vmem:[%s3731_s7] sm:$0xff] }
 0xe24   :  { %2962 = vmatprep.subr.bf16.mxu0 %v3575_v6 }
 0xe27   :  { %2963 = vmatpush3.bf16.msra.mxu0 %v3575_v6  ;;  %v1093_v6 = vld [vmem:[%s3731_s7 + $0x8] sm:$0xff]  ;;  %s3050_s7 = smov 112  }
 0xe28   :  { %2968 = vmatprep.subr.bf16.mxu0 %v3584_v7  ;;  %v1096_v44 = vpack.c.bf16 %v1093_v6, %v1092_v19 }
 0xe2a   :  { %2965 = vmatmul.mubr.msk.bf16.vlgmr.msra.gmra.mxu0 %vm53_vm1, %v2008_v47  ;;  %2988 = vmatprep.mubr.msk.bf16.mxu1 %vm1391_vm5, %v1096_v44 }
 0xe2b   :  { %2969 = vmatpush3.bf16.msra.mxu0 %v3584_v7  ;;  %2972 = vmatprep.mubr.msk.bf16.mxu0 %vm53_vm1, %v2007_v43 }
 0xe2c   :  { %2970 = vmatprep.subr.bf16.mxu0 %v3591_v12 }
 0xe2f   :  { %2971 = vmatpush3.bf16.msra.mxu0 %v3591_v12 }
 0xe32   :  { %2973 = vmatmul.mubr.msk.bf16.vlgmr.msra.gmra.mxu0 %vm53_vm1, %v2008_v47 }
 0xee2   :  { %v2958_v7 = vpop.f32.mrf.mxu0 }
 0xee4   :  { %v2049_v52 = vpop.f32.mrf.mxu0 }
 0xee6   :  { %v2959_v53 = vpop.f32.mrf.mxu0 }
 0xee7   :  { %v2163_v35 = vpack.c.bf16 %v2959_v53, %v2958_v7 }
 0xee8   :  { %v2052_v54 = vpop.f32.mrf.mxu0 }
 0xee9   :  { %v2162_v3 = vpack.c.bf16 %v2052_v54, %v2049_v52 }
 0xeea   :  { %v2966_v46 = vpop.f32.mrf.mxu0 }
 0xeec   :  { %v2098_v55 = vpop.f32.mrf.mxu0 }
 0xeee   :  { %v2967_v12 = vpop.f32.mrf.mxu0 }
 0xeef   :  { %v2165_v5 = vpack.c.bf16 %v2967_v12, %v2966_v46 }
 0xef0   :  { %v2101_v57 = vpop.f32.mrf.mxu0 }
 0xef1   :  { %v2164_v2 = vpack.c.bf16 %v2101_v57, %v2098_v55 }
 0xef2   :  { %v2974_v58 = vpop.f32.mrf.mxu0 }
 0xef4   :  { %v2147_v59 = vpop.f32.mrf.mxu0 }
 0xef6   :  { %v2975_v60 = vpop.f32.mrf.mxu0 }
 0xef7   :  { %v2167_v62 = vpack.c.bf16 %v2975_v60, %v2974_v58 }
 0xef8   :  { %v2150_v63 = vpop.f32.mrf.mxu0 }
 0xef9   :  { %v2166_v0 = vpack.c.bf16 %v2150_v63, %v2147_v59  ;;  %2976 = vmatprep.subr.bf16.mxu1 %v2167_v62 }
 0xefa   :  { %2977 = vmatpush3.bf16.msra.mxu1 %v2167_v62 }
 0xefb   :  { %2978 = vmatprep.subr.bf16.mxu1 %v2166_v0 }
 0xefe   :  { %2979 = vmatpush3.bf16.msra.mxu1 %v2166_v0 }
 0xeff   :  { %2980 = vmatprep.subr.bf16.mxu1 %v2165_v5 }
 0xf02   :  { %2981 = vmatpush3.bf16.msra.mxu1 %v2165_v5 }
 0xf03   :  { %2982 = vmatprep.subr.bf16.mxu1 %v2164_v2 }
 0xf06   :  { %2983 = vmatpush3.bf16.msra.mxu1 %v2164_v2 }
 0xf07   :  { %2984 = vmatprep.subr.bf16.mxu1 %v2163_v35 }
 0xf0a   :  { %2985 = vmatpush3.bf16.msra.mxu1 %v2163_v35 }
 0xf0b   :  { %2986 = vmatprep.subr.bf16.mxu1 %v2162_v3 }
 0xf0e   :  { %2987 = vmatpush3.bf16.msra.mxu1 %v2162_v3 }
 0xf11   :  { %2989 = vmatmul.mubr.msk.bf16.vlgmr.msra.gmra.mxu1 %vm1391_vm5, %v1097_v23 }
 0xfd1   :  { %v2990_v9 = vpop.f32.mrf.mxu1 }
 0xfd2   :  { %v2237_v50 = vadd.f32 %v2990_v9, %v2181_v39 }
 0xfd3   :  { %v2228_v49 = vpop.f32.mrf.mxu1 }
 0xfd4   :  { %v2229_v15 = vadd.f32 %v2228_v49, %v2171_v36  ;;  %v2245_v22 = vmax.f32 %v2237_v50, 0.0 }
 0xfd5   :  { %v2991_v17 = vpop.f32.mrf.mxu1 }
 0xfd6   :  { %v2243_v20 = vmax.f32 %v2229_v15, 0.0  ;;  %v2240_v16 = vadd.f32 %v2991_v17, %v2186_v21  ;;  %v2249_v27 = vadd.f32 %v2245_v22, %v3564_v61 }
 0xfd7   :  { %v2231_v11 = vpop.f32.mrf.mxu1 }
 0xfd8   :  { %v2247_v24 = vadd.f32 %v2243_v20, %v3556_v45  ;;  %v2232_v25 = vadd.f32 %v2231_v11, %v2176_v48  ;;  %v2246_v28 = vmax.f32 %v2240_v16, 0.0 }
 0xfda   :  { %v2244_v26 = vmax.f32 %v2232_v25, 0.0  ;;  %2289 = vrot.lane.b32.xlu1 %v2247_v24, %s3050_s7  ;;  %v2250_v8 = vadd.f32 %v2246_v28, %v3569_v1 }
 0xfdc   :  { %v2248_v29 = vadd.f32 %v2244_v26, %v3560_v56 }
 0xfde   :  { %2291 = vrot.lane.b32.xlu0 %v2248_v29, %s3050_s7  ;;  %2293 = vrot.lane.b32.xlu1 %v2249_v27, %s3050_s7 }
 0xfe2   :  { %2295 = vrot.lane.b32.xlu0 %v2250_v8, %s3050_s7 }
0x1007   :  { %2251 = vxpose.xlu1.b32.start [1/4] (short) (narrow) %v2247_v24, 16 }
0x100b   :  { %2252 = vxpose.xlu1.b32.cont [2/4] (short) (narrow) %v2248_v29, 16 }
0x100f   :  { %2253 = vxpose.xlu1.b32.cont [3/4] (short) (narrow) %v2249_v27, 16 }
0x1013   :  { %2254 = vxpose.xlu1.b32.end [4/4] (short) (narrow) %v2250_v8, 16 }
0x104c   :  { %v2290_v45 = vpop.permute.xlu1 %2289 }
0x104d   :  { %2301 = vxpose.xlu0.b32.start [1/4] (short) (narrow) %v2290_v45, 16 }
0x1050   :  { %v2292_v30 = vpop.permute.xlu0 %2291  ;;  %v2294_v31 = vpop.permute.xlu1 %2293 }
0x1051   :  { %2302 = vxpose.xlu0.b32.cont [2/4] (short) (narrow) %v2292_v30, 16 }
0x1054   :  { %v2296_v32 = vpop.permute.xlu0 %2295 }
0x1055   :  { %2303 = vxpose.xlu0.b32.cont [3/4] (short) (narrow) %v2294_v31, 16 }
0x1059   :  { %2304 = vxpose.xlu0.b32.end [4/4] (short) (narrow) %v2296_v32, 16 }
0x1083   :  { %v2267_v61 = vpop.trf.xlu1 }
0x1084   :  { %2283 = vst.msk [vmem:[#allocation2] sm:$0xff] %vm53_vm1, %v2267_v61 }
0x1087   :  { %v2268_v56 = vpop.trf.xlu1 }
0x1088   :  { %2284 = vst.msk [vmem:[#allocation2 + $0x8] sm:$0xff] %vm53_vm1, %v2268_v56 }
0x10c9   :  { %v2317_v1 = vpop.trf.xlu0 }
0x10ca   :  { %2334 = vst.msk [vmem:[#allocation2 + $0x10] sm:$0xff] %vm53_vm1, %v2317_v1 }
0x10cd   :  { %v2318_v33 = vpop.trf.xlu0 }
0x10ce   :  { %2335 = vst.msk [vmem:[#allocation2 + $0x18] sm:$0xff] %vm53_vm1, %v2318_v33 }
0x10cf   :  { %3033 = shalt.err (!%p3030_p4)
}
0x10d0   :  { %s3052_s16 = smov 128   ;;  %s3053_s17 = smov 8  }
0x10d1   :  { %2347 = dma.vmem_to_hbm [thread:$0]  %s2342_s4, 512, %s3735_s11, [#allocation3], %s3052_s16, %s3052_s16, %s3053_s17  }
0x10d2   :  { %3042 = dma.done.wait [#allocation3], 512  }
0x10d3   :  { %3043 = vsyncadd [#allocation3], 4294966784 }
0x10d4   :  { %2351 = vsyncpa [#allocation3], 1 }

</bundles_post_ra>
